<compile_context>
chip_gen: v6e
topology: v6e:2x2x1
jax: 0.10.0
libtpu: 0.0.40
codegen_flags: <defaults>
</compile_context>

<pallas_src>
import functools
import math

import jax
import jax.numpy as jnp
from jax.experimental import pallas as pl
from jax.experimental.pallas import tpu as pltpu


def _cdiv(a, b):
    return -(-a // b)


def _pick_batch_block(n, out_len, target_lanes=512):
    """Fold Nb batch elements into the lane axis of each grid step.

    Targets ~target_lanes lanes per matmul, but keeps >=2 grid steps when the
    batch allows (second TensorCore on dual-TC chips) and requires Nb | N."""
    nb = max(1, min(n, target_lanes // max(out_len, 1)))
    while nb > 1 and _cdiv(n, nb) < 2:
        nb -= 1
    while n % nb:
        nb -= 1
    return nb


def _convt_phase_kernel(x_ref, w_ref, b_ref, o_ref, a_ref, *,
                        tap_starts, cin2, cout2, ck, out_len, nb):
    """One grid step = one block of `nb` batch elements.

    x_ref: (Nb, 2*Cin, Hp*Wp)        zero-padded input, spatial flattened row-major
    w_ref: (2*Cout, s*s*Ck)          lane-dense packed per-phase complex block weights
    b_ref: (2*Cout, 1)               packed complex bias
    o_ref: (1, s*s, 2*Cout, Nb*out_len)  per-phase output planes (lanes = batch x flat spatial)
    a_ref: (Ck, Nb*out_len)          VMEM scratch: im2col matrix for the current phase
    """
    lanes = nb * out_len
    # Hoisted once per grid step (JAX does not CSE broadcast_in_dim).
    bias = jnp.broadcast_to(b_ref[...], (cout2, lanes))
    for ph, starts in enumerate(tap_starts):              # phases: static unroll
        # Build the im2col matrix: each tap is a contiguous static slice of the
        # flattened input (channels in sublanes, batch x flat spatial in lanes).
        for b in range(nb):                                # batch: static unroll
            for t, st in enumerate(starts):                # taps: static unroll
                a_ref[t * cin2:(t + 1) * cin2,
                      b * out_len:(b + 1) * out_len] = x_ref[b, :, st:st + out_len]
        # One fused MXU matmul per phase; weights sliced lane-dense per phase.
        y = jnp.dot(w_ref[:, ph * ck:(ph + 1) * ck], a_ref[...],
                    preferred_element_type=jnp.float32) + bias
        o_ref[0, ph] = y.astype(o_ref.dtype)


def complex_conv_transpose2d(x, w_real, w_imag, b_real, b_imag,
                             stride, padding, output_padding):
    """x: complex64 (N, Cin, H, W).  Weights: (Cin, Cout, K, K) PyTorch layout."""
    N, Cin, H, W = x.shape
    Cout, K = w_real.shape[1], w_real.shape[2]
    s, p, op = stride, padding, output_padding
    Hout = (H - 1) * s - 2 * p + K + op
    Wout = (W - 1) * s - 2 * p + K + op

    Mx = _cdiv(K, s)                          # taps per spatial dim per phase (max)
    Qh, Qw = _cdiv(Hout, s), _cdiv(Wout, s)   # output rows/cols per phase
    d_min, d_max = p // s, (s - 1 + p) // s
    pad_lo = max(Mx - 1 - d_min, 0)
    pad_hi_h = max(Qh + d_max - H + 1, 0)     # +1 row of slack for flat slices
    pad_hi_w = max(Qw + d_max - W, 0)
    Hp = pad_lo + H + pad_hi_h
    Wp = pad_lo + W + pad_hi_w

    # Lane density: widen Wp so out_len = Qh*Wp is a multiple of 128
    # (unmasked full-lane stores, full MXU lane tile) when slack is modest.
    if (Qh * Wp) % 128 != 0:
        g = 128 // math.gcd(128, Qh)          # Wp must be a multiple of g
        wp_pad = _cdiv(Wp, g) * g
        if wp_pad <= 2 * Wp:
            Wp = wp_pad
    pad_hi_w = Wp - pad_lo - W

    Cin2, Cout2 = 2 * Cin, 2 * Cout
    Ck = Mx * Mx * Cin2
    out_len = Qh * Wp

    Nb = _pick_batch_block(N, out_len)        # batch elements folded into lanes
    Gn = N // Nb                              # grid steps

    # ---- input: stack [real ; imag] channels, zero-pad, flatten spatial ------
    xr = jnp.real(x).astype(jnp.float32)
    xi = jnp.imag(x).astype(jnp.float32)
    xs = jnp.concatenate([xr, xi], axis=1)                       # (N, 2Cin, H, W)
    xs = jnp.pad(xs, ((0, 0), (0, 0), (pad_lo, pad_hi_h), (pad_lo, pad_hi_w)))
    xflat = xs.reshape(N, Cin2, Hp * Wp)

    # ---- weights: per phase, fold (taps x stacked channels); pack lane-dense -
    wr = w_real.astype(jnp.float32)
    wi = w_imag.astype(jnp.float32)
    phase_blocks = []
    tap_starts = []
    for rh in range(s):
        th, dh = (rh + p) % s, (rh + p) // s
        for rw in range(s):
            tw, dw = (rw + p) % s, (rw + p) // s
            taps_w, taps_s = [], []
            for j in range(Mx):
                kh = s * j + th
                hs = pad_lo + dh - j
                for k in range(Mx):
                    kw = s * k + tw
                    ws = pad_lo + dw - k
                    taps_s.append(hs * Wp + ws)        # static flat slice start
                    if kh < K and kw < K:
                        wrt = wr[:, :, kh, kw].T        # (Cout, Cin)
                        wit = wi[:, :, kh, kw].T
                        blk = jnp.concatenate(
                            [jnp.concatenate([wrt, -wit], axis=1),   # real out
                             jnp.concatenate([wit,  wrt], axis=1)],  # imag out
                            axis=0)                     # (2Cout, 2Cin)
                    else:                               # padded (inactive) tap
                        blk = jnp.zeros((Cout2, Cin2), jnp.float32)
                    taps_w.append(blk)
            phase_blocks.append(jnp.concatenate(taps_w, axis=1))   # (2Cout, Ck)
            tap_starts.append(tuple(taps_s))
    wpk = jnp.concatenate(phase_blocks, axis=1)          # (2Cout, s*s*Ck) lane-dense
    tap_starts = tuple(tap_starts)
    assert max(max(ts) for ts in tap_starts) + out_len <= Hp * Wp

    bc = jnp.concatenate([b_real - b_imag, b_real + b_imag]).astype(jnp.float32)
    bc = bc.reshape(Cout2, 1)

    # ---- VMEM budget & scheduler cost hint ------------------------------------
    blk_bytes = 4 * (Nb * Cin2 * Hp * Wp            # x block
                     + Cout2 * s * s * Ck           # packed weights
                     + Cout2                        # bias
                     + s * s * Cout2 * Nb * out_len)  # out block
    vmem_need = 2 * blk_bytes + 4 * Ck * Nb * out_len   # double-buffered + scratch
    vmem_limit = int(min(100 * 1024 * 1024, max(32 * 1024 * 1024, 2 * vmem_need)))
    cost = pl.CostEstimate(
        flops=2 * N * s * s * Cout2 * Ck * out_len,
        transcendentals=0,
        bytes_accessed=4 * (N * Cin2 * Hp * Wp + Cout2 * s * s * Ck + Cout2
                            + N * s * s * Cout2 * out_len))

    kernel = functools.partial(_convt_phase_kernel, tap_starts=tap_starts,
                               cin2=Cin2, cout2=Cout2, ck=Ck,
                               out_len=out_len, nb=Nb)
    out = pl.pallas_call(
        kernel,
        out_shape=jax.ShapeDtypeStruct((Gn, s * s, Cout2, Nb * out_len),
                                       jnp.float32),
        grid_spec=pltpu.PrefetchScalarGridSpec(
            num_scalar_prefetch=0,
            grid=(Gn,),
            in_specs=[
                pl.BlockSpec((Nb, Cin2, Hp * Wp), lambda g: (g, 0, 0)),
                pl.BlockSpec((Cout2, s * s * Ck), lambda g: (0, 0)),
                pl.BlockSpec((Cout2, 1), lambda g: (0, 0)),
            ],
            out_specs=pl.BlockSpec((1, s * s, Cout2, Nb * out_len),
                                   lambda g: (g, 0, 0, 0)),
            scratch_shapes=[pltpu.VMEM((Ck, Nb * out_len), jnp.float32)],
        ),
        compiler_params=pltpu.CompilerParams(
            dimension_semantics=("parallel",),
            vmem_limit_bytes=vmem_limit),
        cost_estimate=cost,
    )(xflat, wpk, bc)

    # Un-flatten, drop the Wp-vs-Qw slack columns, interleave the s*s phases.
    o7 = out.reshape(Gn, s, s, Cout2, Nb, Qh, Wp)[..., :Qw]
    y = o7.transpose(0, 4, 3, 5, 1, 6, 2).reshape(N, Cout2, Qh * s, Qw * s)
    y = y[:, :, :Hout, :Wout]
    return jax.lax.complex(y[:, :Cout], y[:, Cout:])


# ----------------------- pure-JAX reference (for checking) -----------------------
def _ref_conv_transpose(x_nchw, w, b, s, p, op):
    K = w.shape[2]
    x_nhwc = x_nchw.transpose(0, 2, 3, 1)
    w_hwio = jnp.flip(w, (2, 3)).transpose(2, 3, 0, 1)
    lo, hi = K - 1 - p, K - 1 - p + op
    y = jax.lax.conv_general_dilated(
        x_nhwc, w_hwio, window_strides=(1, 1),
        padding=[(lo, hi), (lo, hi)], lhs_dilation=(s, s),
        dimension_numbers=("NHWC", "HWIO", "NHWC"))
    return y.transpose(0, 3, 1, 2) + b.reshape(1, -1, 1, 1)


def _ref_complex(x, wr, wi, br, bi, s, p, op):
    xr, xi = jnp.real(x), jnp.imag(x)
    ct_r = (_ref_conv_transpose(xr, wr, br, s, p, op)
            - _ref_conv_transpose(xi, wi, bi, s, p, op))
    ct_i = (_ref_conv_transpose(xr, wi, bi, s, p, op)
            + _ref_conv_transpose(xi, wr, br, s, p, op))
    return jax.lax.complex(ct_r, ct_i)


if __name__ == "__main__":
    # Module hyperparameters (small, consistent with the PyTorch module).
    N, Cin, Cout = 2, 4, 4
    H = W = 16
    K, stride, padding, output_padding = 3, 2, 1, 1

    key = jax.random.PRNGKey(0)
    k_xr, k_xi, k_wr, k_wi, k_br, k_bi = jax.random.split(key, 6)

    # Deterministic xavier-uniform-style init for weights (Cin, Cout, K, K).
    fan_in, fan_out = Cout * K * K, Cin * K * K
    bound = (6.0 / (fan_in + fan_out)) ** 0.5
    w_real = jax.random.uniform(k_wr, (Cin, Cout, K, K), jnp.float32, -bound, bound)
    w_imag = jax.random.uniform(k_wi, (Cin, Cout, K, K), jnp.float32, -bound, bound)
    bbound = 1.0 / (Cin * K * K) ** 0.5
    b_real = jax.random.uniform(k_br, (Cout,), jnp.float32, -bbound, bbound)
    b_imag = jax.random.uniform(k_bi, (Cout,), jnp.float32, -bbound, bbound)

    x = jax.lax.complex(
        jax.random.normal(k_xr, (N, Cin, H, W), jnp.float32),
        jax.random.normal(k_xi, (N, Cin, H, W), jnp.float32))

    fwd = jax.jit(functools.partial(
        complex_conv_transpose2d, stride=stride, padding=padding,
        output_padding=output_padding))
    out = jax.block_until_ready(fwd(x, w_real, w_imag, b_real, b_imag))

    ref = _ref_complex(x, w_real, w_imag, b_real, b_imag,
                       stride, padding, output_padding)

    Hout = (H - 1) * stride - 2 * padding + K + output_padding
    Wout = (W - 1) * stride - 2 * padding + K + output_padding
    assert out.shape == (N, Cout, Hout, Wout)
    assert out.dtype == jnp.complex64
    assert jnp.allclose(jnp.real(out), jnp.real(ref), rtol=2e-4, atol=2e-4)
    assert jnp.allclose(jnp.imag(out), jnp.imag(ref), rtol=2e-4, atol=2e-4)

    print("KERNEL_OK")
</pallas_src>

<mosaic_0001>
module attributes {stable_mosaic.version = 11 : i64} {
  func.func @_convt_phase_kernel(%arg0: i32, %arg1: memref<1x8x456xf32, #tpu.memory_space<vmem>>, %arg2: memref<8x128xf32, #tpu.memory_space<vmem>>, %arg3: memref<8x1xf32, #tpu.memory_space<vmem>>, %arg4: memref<1x4x8x384xf32, #tpu.memory_space<vmem>>, %arg5: memref<32x384xf32, #tpu.memory_space<vmem>>) attributes {dimension_semantics = [#tpu.dimension_semantics<parallel>], iteration_bounds = array<i64: 2>, scalar_prefetch = 0 : i64, scratch_operands = 1 : i64, tpu.core_type = #tpu.core_type<tc>, window_params = [{transform_indices = @transform_0, window_bounds = array<i64: 1, 8, 456>}, {pipeline_mode = #tpu.pipeline_mode<synchronous>, transform_indices = @transform_1, window_bounds = array<i64: 8, 128>}, {pipeline_mode = #tpu.pipeline_mode<synchronous>, transform_indices = @transform_2, window_bounds = array<i64: 8, 1>}, {transform_indices = @transform_3, window_bounds = array<i64: 1, 4, 8, 384>}]} {
    %c0 = arith.constant 0 : index
    %c0_0 = arith.constant 0 : index
    %0 = vector.load %arg3[%c0, %c0_0] : memref<8x1xf32, #tpu.memory_space<vmem>>, vector<8x1xf32>
    %1 = vector.shape_cast %0 : vector<8x1xf32> to vector<8x1xf32>
    %2 = vector.broadcast %1 : vector<8x1xf32> to vector<8x384xf32>
    %c0_1 = arith.constant 0 : index
    %c0_2 = arith.constant 0 : index
    %c25 = arith.constant 25 : index
    %3 = vector.load %arg1[%c0_1, %c0_2, %c25] : memref<1x8x456xf32, #tpu.memory_space<vmem>>, vector<1x8x384xf32>
    %4 = vector.shape_cast %3 : vector<1x8x384xf32> to vector<8x384xf32>
    %c0_3 = arith.constant 0 : index
    %c0_4 = arith.constant 0 : index
    %5 = vector.load %arg5[%c0_3, %c0_4] : memref<32x384xf32, #tpu.memory_space<vmem>>, vector<8x384xf32>
    tpu.vector_store %arg5[%c0_3, %c0_4], %4 {strides = array<i32>} : memref<32x384xf32, #tpu.memory_space<vmem>>, vector<8x384xf32>,
    %c0_5 = arith.constant 0 : index
    %c0_6 = arith.constant 0 : index
    %c24 = arith.constant 24 : index
    %6 = vector.load %arg1[%c0_5, %c0_6, %c24] : memref<1x8x456xf32, #tpu.memory_space<vmem>>, vector<1x8x384xf32>
    %7 = vector.shape_cast %6 : vector<1x8x384xf32> to vector<8x384xf32>
    %c8 = arith.constant 8 : index
    %c0_7 = arith.constant 0 : index
    %8 = vector.load %arg5[%c8, %c0_7] : memref<32x384xf32, #tpu.memory_space<vmem>>, vector<8x384xf32>
    tpu.vector_store %arg5[%c8, %c0_7], %7 {strides = array<i32>} : memref<32x384xf32, #tpu.memory_space<vmem>>, vector<8x384xf32>,
    %c0_8 = arith.constant 0 : index
    %c0_9 = arith.constant 0 : index
    %c1 = arith.constant 1 : index
    %9 = vector.load %arg1[%c0_8, %c0_9, %c1] : memref<1x8x456xf32, #tpu.memory_space<vmem>>, vector<1x8x384xf32>
    %10 = vector.shape_cast %9 : vector<1x8x384xf32> to vector<8x384xf32>
    %c16 = arith.constant 16 : index
    %c0_10 = arith.constant 0 : index
    %11 = vector.load %arg5[%c16, %c0_10] : memref<32x384xf32, #tpu.memory_space<vmem>>, vector<8x384xf32>
    tpu.vector_store %arg5[%c16, %c0_10], %10 {strides = array<i32>} : memref<32x384xf32, #tpu.memory_space<vmem>>, vector<8x384xf32>,
    %c0_11 = arith.constant 0 : index
    %c0_12 = arith.constant 0 : index
    %c0_13 = arith.constant 0 : index
    %12 = vector.load %arg1[%c0_11, %c0_12, %c0_13] : memref<1x8x456xf32, #tpu.memory_space<vmem>>, vector<1x8x384xf32>
    %13 = vector.shape_cast %12 : vector<1x8x384xf32> to vector<8x384xf32>
    %c24_14 = arith.constant 24 : index
    %c0_15 = arith.constant 0 : index
    %14 = vector.load %arg5[%c24_14, %c0_15] : memref<32x384xf32, #tpu.memory_space<vmem>>, vector<8x384xf32>
    tpu.vector_store %arg5[%c24_14, %c0_15], %13 {strides = array<i32>} : memref<32x384xf32, #tpu.memory_space<vmem>>, vector<8x384xf32>,
    %c0_16 = arith.constant 0 : index
    %c0_17 = arith.constant 0 : index
    %15 = vector.load %arg2[%c0_16, %c0_17] : memref<8x128xf32, #tpu.memory_space<vmem>>, vector<8x32xf32>
    %c0_18 = arith.constant 0 : index
    %c0_19 = arith.constant 0 : index
    %16 = vector.load %arg5[%c0_18, %c0_19] : memref<32x384xf32, #tpu.memory_space<vmem>>, vector<32x384xf32>
    %cst = arith.constant dense<0.000000e+00> : vector<8x384xf32>
    %17 = tpu.matmul %15, %16, %cst {dimension_numbers = #tpu.dot_dimension_numbers<[1], [0], [0], [1], [0, 0, 1, 1], [], []>} : vector<8x32xf32>, vector<32x384xf32>, vector<8x384xf32> -> vector<8x384xf32>
    %18 = arith.addf %17, %2 : vector<8x384xf32>
    %c0_20 = arith.constant 0 : index
    %c0_21 = arith.constant 0 : index
    %c0_22 = arith.constant 0 : index
    %c0_23 = arith.constant 0 : index
    %19 = vector.load %arg4[%c0_20, %c0_21, %c0_22, %c0_23] : memref<1x4x8x384xf32, #tpu.memory_space<vmem>>, vector<1x1x8x384xf32>
    %20 = vector.shape_cast %19 : vector<1x1x8x384xf32> to vector<8x384xf32>
    %21 = vector.shape_cast %18 : vector<8x384xf32> to vector<1x1x8x384xf32>
    tpu.vector_store %arg4[%c0_20, %c0_21, %c0_22, %c0_23], %21 {strides = array<i32>} : memref<1x4x8x384xf32, #tpu.memory_space<vmem>>, vector<1x1x8x384xf32>,
    %c0_24 = arith.constant 0 : index
    %c0_25 = arith.constant 0 : index
    %c26 = arith.constant 26 : index
    %22 = vector.load %arg1[%c0_24, %c0_25, %c26] : memref<1x8x456xf32, #tpu.memory_space<vmem>>, vector<1x8x384xf32>
    %23 = vector.shape_cast %22 : vector<1x8x384xf32> to vector<8x384xf32>
    %c0_26 = arith.constant 0 : index
    %c0_27 = arith.constant 0 : index
    %24 = vector.load %arg5[%c0_26, %c0_27] : memref<32x384xf32, #tpu.memory_space<vmem>>, vector<8x384xf32>
    tpu.vector_store %arg5[%c0_26, %c0_27], %23 {strides = array<i32>} : memref<32x384xf32, #tpu.memory_space<vmem>>, vector<8x384xf32>,
    %c0_28 = arith.constant 0 : index
    %c0_29 = arith.constant 0 : index
    %c25_30 = arith.constant 25 : index
    %25 = vector.load %arg1[%c0_28, %c0_29, %c25_30] : memref<1x8x456xf32, #tpu.memory_space<vmem>>, vector<1x8x384xf32>
    %26 = vector.shape_cast %25 : vector<1x8x384xf32> to vector<8x384xf32>
    %c8_31 = arith.constant 8 : index
    %c0_32 = arith.constant 0 : index
    %27 = vector.load %arg5[%c8_31, %c0_32] : memref<32x384xf32, #tpu.memory_space<vmem>>, vector<8x384xf32>
    tpu.vector_store %arg5[%c8_31, %c0_32], %26 {strides = array<i32>} : memref<32x384xf32, #tpu.memory_space<vmem>>, vector<8x384xf32>,
    %c0_33 = arith.constant 0 : index
    %c0_34 = arith.constant 0 : index
    %c2 = arith.constant 2 : index
    %28 = vector.load %arg1[%c0_33, %c0_34, %c2] : memref<1x8x456xf32, #tpu.memory_space<vmem>>, vector<1x8x384xf32>
    %29 = vector.shape_cast %28 : vector<1x8x384xf32> to vector<8x384xf32>
    %c16_35 = arith.constant 16 : index
    %c0_36 = arith.constant 0 : index
    %30 = vector.load %arg5[%c16_35, %c0_36] : memref<32x384xf32, #tpu.memory_space<vmem>>, vector<8x384xf32>
    tpu.vector_store %arg5[%c16_35, %c0_36], %29 {strides = array<i32>} : memref<32x384xf32, #tpu.memory_space<vmem>>, vector<8x384xf32>,
    %c0_37 = arith.constant 0 : index
    %c0_38 = arith.constant 0 : index
    %c1_39 = arith.constant 1 : index
    %31 = vector.load %arg1[%c0_37, %c0_38, %c1_39] : memref<1x8x456xf32, #tpu.memory_space<vmem>>, vector<1x8x384xf32>
    %32 = vector.shape_cast %31 : vector<1x8x384xf32> to vector<8x384xf32>
    %c24_40 = arith.constant 24 : index
    %c0_41 = arith.constant 0 : index
    %33 = vector.load %arg5[%c24_40, %c0_41] : memref<32x384xf32, #tpu.memory_space<vmem>>, vector<8x384xf32>
    tpu.vector_store %arg5[%c24_40, %c0_41], %32 {strides = array<i32>} : memref<32x384xf32, #tpu.memory_space<vmem>>, vector<8x384xf32>,
    %c0_42 = arith.constant 0 : index
    %c32 = arith.constant 32 : index
    %34 = vector.load %arg2[%c0_42, %c32] : memref<8x128xf32, #tpu.memory_space<vmem>>, vector<8x32xf32>
    %c0_43 = arith.constant 0 : index
    %c0_44 = arith.constant 0 : index
    %35 = vector.load %arg5[%c0_43, %c0_44] : memref<32x384xf32, #tpu.memory_space<vmem>>, vector<32x384xf32>
    %cst_45 = arith.constant dense<0.000000e+00> : vector<8x384xf32>
    %36 = tpu.matmul %34, %35, %cst_45 {dimension_numbers = #tpu.dot_dimension_numbers<[1], [0], [0], [1], [0, 0, 1, 1], [], []>} : vector<8x32xf32>, vector<32x384xf32>, vector<8x384xf32> -> vector<8x384xf32>
    %37 = arith.addf %36, %2 : vector<8x384xf32>
    %c0_46 = arith.constant 0 : index
    %c1_47 = arith.constant 1 : index
    %c0_48 = arith.constant 0 : index
    %c0_49 = arith.constant 0 : index
    %38 = vector.load %arg4[%c0_46, %c1_47, %c0_48, %c0_49] : memref<1x4x8x384xf32, #tpu.memory_space<vmem>>, vector<1x1x8x384xf32>
    %39 = vector.shape_cast %38 : vector<1x1x8x384xf32> to vector<8x384xf32>
    %40 = vector.shape_cast %37 : vector<8x384xf32> to vector<1x1x8x384xf32>
    tpu.vector_store %arg4[%c0_46, %c1_47, %c0_48, %c0_49], %40 {strides = array<i32>} : memref<1x4x8x384xf32, #tpu.memory_space<vmem>>, vector<1x1x8x384xf32>,
    %c0_50 = arith.constant 0 : index
    %c0_51 = arith.constant 0 : index
    %c49 = arith.constant 49 : index
    %41 = vector.load %arg1[%c0_50, %c0_51, %c49] : memref<1x8x456xf32, #tpu.memory_space<vmem>>, vector<1x8x384xf32>
    %42 = vector.shape_cast %41 : vector<1x8x384xf32> to vector<8x384xf32>
    %c0_52 = arith.constant 0 : index
    %c0_53 = arith.constant 0 : index
    %43 = vector.load %arg5[%c0_52, %c0_53] : memref<32x384xf32, #tpu.memory_space<vmem>>, vector<8x384xf32>
    tpu.vector_store %arg5[%c0_52, %c0_53], %42 {strides = array<i32>} : memref<32x384xf32, #tpu.memory_space<vmem>>, vector<8x384xf32>,
    %c0_54 = arith.constant 0 : index
    %c0_55 = arith.constant 0 : index
    %c48 = arith.constant 48 : index
    %44 = vector.load %arg1[%c0_54, %c0_55, %c48] : memref<1x8x456xf32, #tpu.memory_space<vmem>>, vector<1x8x384xf32>
    %45 = vector.shape_cast %44 : vector<1x8x384xf32> to vector<8x384xf32>
    %c8_56 = arith.constant 8 : index
    %c0_57 = arith.constant 0 : index
    %46 = vector.load %arg5[%c8_56, %c0_57] : memref<32x384xf32, #tpu.memory_space<vmem>>, vector<8x384xf32>
    tpu.vector_store %arg5[%c8_56, %c0_57], %45 {strides = array<i32>} : memref<32x384xf32, #tpu.memory_space<vmem>>, vector<8x384xf32>,
    %c0_58 = arith.constant 0 : index
    %c0_59 = arith.constant 0 : index
    %c25_60 = arith.constant 25 : index
    %47 = vector.load %arg1[%c0_58, %c0_59, %c25_60] : memref<1x8x456xf32, #tpu.memory_space<vmem>>, vector<1x8x384xf32>
    %48 = vector.shape_cast %47 : vector<1x8x384xf32> to vector<8x384xf32>
    %c16_61 = arith.constant 16 : index
    %c0_62 = arith.constant 0 : index
    %49 = vector.load %arg5[%c16_61, %c0_62] : memref<32x384xf32, #tpu.memory_space<vmem>>, vector<8x384xf32>
    tpu.vector_store %arg5[%c16_61, %c0_62], %48 {strides = array<i32>} : memref<32x384xf32, #tpu.memory_space<vmem>>, vector<8x384xf32>,
    %c0_63 = arith.constant 0 : index
    %c0_64 = arith.constant 0 : index
    %c24_65 = arith.constant 24 : index
    %50 = vector.load %arg1[%c0_63, %c0_64, %c24_65] : memref<1x8x456xf32, #tpu.memory_space<vmem>>, vector<1x8x384xf32>
    %51 = vector.shape_cast %50 : vector<1x8x384xf32> to vector<8x384xf32>
    %c24_66 = arith.constant 24 : index
    %c0_67 = arith.constant 0 : index
    %52 = vector.load %arg5[%c24_66, %c0_67] : memref<32x384xf32, #tpu.memory_space<vmem>>, vector<8x384xf32>
    tpu.vector_store %arg5[%c24_66, %c0_67], %51 {strides = array<i32>} : memref<32x384xf32, #tpu.memory_space<vmem>>, vector<8x384xf32>,
    %c0_68 = arith.constant 0 : index
    %c64 = arith.constant 64 : index
    %53 = vector.load %arg2[%c0_68, %c64] : memref<8x128xf32, #tpu.memory_space<vmem>>, vector<8x32xf32>
    %c0_69 = arith.constant 0 : index
    %c0_70 = arith.constant 0 : index
    %54 = vector.load %arg5[%c0_69, %c0_70] : memref<32x384xf32, #tpu.memory_space<vmem>>, vector<32x384xf32>
    %cst_71 = arith.constant dense<0.000000e+00> : vector<8x384xf32>
    %55 = tpu.matmul %53, %54, %cst_71 {dimension_numbers = #tpu.dot_dimension_numbers<[1], [0], [0], [1], [0, 0, 1, 1], [], []>} : vector<8x32xf32>, vector<32x384xf32>, vector<8x384xf32> -> vector<8x384xf32>
    %56 = arith.addf %55, %2 : vector<8x384xf32>
    %c0_72 = arith.constant 0 : index
    %c2_73 = arith.constant 2 : index
    %c0_74 = arith.constant 0 : index
    %c0_75 = arith.constant 0 : index
    %57 = vector.load %arg4[%c0_72, %c2_73, %c0_74, %c0_75] : memref<1x4x8x384xf32, #tpu.memory_space<vmem>>, vector<1x1x8x384xf32>
    %58 = vector.shape_cast %57 : vector<1x1x8x384xf32> to vector<8x384xf32>
    %59 = vector.shape_cast %56 : vector<8x384xf32> to vector<1x1x8x384xf32>
    tpu.vector_store %arg4[%c0_72, %c2_73, %c0_74, %c0_75], %59 {strides = array<i32>} : memref<1x4x8x384xf32, #tpu.memory_space<vmem>>, vector<1x1x8x384xf32>,
    %c0_76 = arith.constant 0 : index
    %c0_77 = arith.constant 0 : index
    %c50 = arith.constant 50 : index
    %60 = vector.load %arg1[%c0_76, %c0_77, %c50] : memref<1x8x456xf32, #tpu.memory_space<vmem>>, vector<1x8x384xf32>
    %61 = vector.shape_cast %60 : vector<1x8x384xf32> to vector<8x384xf32>
    %c0_78 = arith.constant 0 : index
    %c0_79 = arith.constant 0 : index
    %62 = vector.load %arg5[%c0_78, %c0_79] : memref<32x384xf32, #tpu.memory_space<vmem>>, vector<8x384xf32>
    tpu.vector_store %arg5[%c0_78, %c0_79], %61 {strides = array<i32>} : memref<32x384xf32, #tpu.memory_space<vmem>>, vector<8x384xf32>,
    %c0_80 = arith.constant 0 : index
    %c0_81 = arith.constant 0 : index
    %c49_82 = arith.constant 49 : index
    %63 = vector.load %arg1[%c0_80, %c0_81, %c49_82] : memref<1x8x456xf32, #tpu.memory_space<vmem>>, vector<1x8x384xf32>
    %64 = vector.shape_cast %63 : vector<1x8x384xf32> to vector<8x384xf32>
    %c8_83 = arith.constant 8 : index
    %c0_84 = arith.constant 0 : index
    %65 = vector.load %arg5[%c8_83, %c0_84] : memref<32x384xf32, #tpu.memory_space<vmem>>, vector<8x384xf32>
    tpu.vector_store %arg5[%c8_83, %c0_84], %64 {strides = array<i32>} : memref<32x384xf32, #tpu.memory_space<vmem>>, vector<8x384xf32>,
    %c0_85 = arith.constant 0 : index
    %c0_86 = arith.constant 0 : index
    %c26_87 = arith.constant 26 : index
    %66 = vector.load %arg1[%c0_85, %c0_86, %c26_87] : memref<1x8x456xf32, #tpu.memory_space<vmem>>, vector<1x8x384xf32>
    %67 = vector.shape_cast %66 : vector<1x8x384xf32> to vector<8x384xf32>
    %c16_88 = arith.constant 16 : index
    %c0_89 = arith.constant 0 : index
    %68 = vector.load %arg5[%c16_88, %c0_89] : memref<32x384xf32, #tpu.memory_space<vmem>>, vector<8x384xf32>
    tpu.vector_store %arg5[%c16_88, %c0_89], %67 {strides = array<i32>} : memref<32x384xf32, #tpu.memory_space<vmem>>, vector<8x384xf32>,
    %c0_90 = arith.constant 0 : index
    %c0_91 = arith.constant 0 : index
    %c25_92 = arith.constant 25 : index
    %69 = vector.load %arg1[%c0_90, %c0_91, %c25_92] : memref<1x8x456xf32, #tpu.memory_space<vmem>>, vector<1x8x384xf32>
    %70 = vector.shape_cast %69 : vector<1x8x384xf32> to vector<8x384xf32>
    %c24_93 = arith.constant 24 : index
    %c0_94 = arith.constant 0 : index
    %71 = vector.load %arg5[%c24_93, %c0_94] : memref<32x384xf32, #tpu.memory_space<vmem>>, vector<8x384xf32>
    tpu.vector_store %arg5[%c24_93, %c0_94], %70 {strides = array<i32>} : memref<32x384xf32, #tpu.memory_space<vmem>>, vector<8x384xf32>,
    %c0_95 = arith.constant 0 : index
    %c96 = arith.constant 96 : index
    %72 = vector.load %arg2[%c0_95, %c96] : memref<8x128xf32, #tpu.memory_space<vmem>>, vector<8x32xf32>
    %c0_96 = arith.constant 0 : index
    %c0_97 = arith.constant 0 : index
    %73 = vector.load %arg5[%c0_96, %c0_97] : memref<32x384xf32, #tpu.memory_space<vmem>>, vector<32x384xf32>
    %cst_98 = arith.constant dense<0.000000e+00> : vector<8x384xf32>
    %74 = tpu.matmul %72, %73, %cst_98 {dimension_numbers = #tpu.dot_dimension_numbers<[1], [0], [0], [1], [0, 0, 1, 1], [], []>} : vector<8x32xf32>, vector<32x384xf32>, vector<8x384xf32> -> vector<8x384xf32>
    %75 = arith.addf %74, %2 : vector<8x384xf32>
    %c0_99 = arith.constant 0 : index
    %c3 = arith.constant 3 : index
    %c0_100 = arith.constant 0 : index
    %c0_101 = arith.constant 0 : index
    %76 = vector.load %arg4[%c0_99, %c3, %c0_100, %c0_101] : memref<1x4x8x384xf32, #tpu.memory_space<vmem>>, vector<1x1x8x384xf32>
    %77 = vector.shape_cast %76 : vector<1x1x8x384xf32> to vector<8x384xf32>
    %78 = vector.shape_cast %75 : vector<8x384xf32> to vector<1x1x8x384xf32>
    tpu.vector_store %arg4[%c0_99, %c3, %c0_100, %c0_101], %78 {strides = array<i32>} : memref<1x4x8x384xf32, #tpu.memory_space<vmem>>, vector<1x1x8x384xf32>,
    return
  }
  func.func @transform_0(%arg0: i32) -> (i32, i32, i32) {
    %c0_i32 = arith.constant 0 : i32
    %c0_i32_0 = arith.constant 0 : i32
    %c0_i32_1 = arith.constant 0 : i32
    return %arg0, %c0_i32, %c0_i32_0 : i32, i32, i32
  }
  func.func @transform_1(%arg0: i32) -> (i32, i32) {
    %c0_i32 = arith.constant 0 : i32
    %c0_i32_0 = arith.constant 0 : i32
    %c0_i32_1 = arith.constant 0 : i32
    return %c0_i32, %c0_i32_0 : i32, i32
  }
  func.func @transform_2(%arg0: i32) -> (i32, i32) {
    %c0_i32 = arith.constant 0 : i32
    %c0_i32_0 = arith.constant 0 : i32
    %c0_i32_1 = arith.constant 0 : i32
    return %c0_i32, %c0_i32_0 : i32, i32
  }
  func.func @transform_3(%arg0: i32) -> (i32, i32, i32, i32) {
    %c0_i32 = arith.constant 0 : i32
    %c0_i32_0 = arith.constant 0 : i32
    %c0_i32_1 = arith.constant 0 : i32
    %c0_i32_2 = arith.constant 0 : i32
    return %arg0, %c0_i32, %c0_i32_0, %c0_i32_1 : i32, i32, i32, i32
  }
}

</mosaic_0001>

<bundles_post_ra>
// kernel: custom-call.1
= control target key start
LH: loop header
LB: loop body
LE: loop exit
PB: predicated region body
PF: predicated region fallthrough
CT: control target
= control target key end

     0   :  { %s51_s0 = inlined_call_operand.hbm [shape: c64[2,4,16,16], index: 0, kind: input, shape index: {}]   ;;  %s52_s1 = inlined_call_operand.vmem [shape: f32[2,4,16,16], index: 1, kind: output, shape index: {}]  }
   0x1   :  { %s2_s8 = scalar_lea.hbm %s51_s0, 2048 }
   0x2   :  { %3 = vsyncpa [#allocation0], 0  ;;  %s4_s11 = sshll.u32 %s52_s1, 4  ;;  %s5_s11 = int_to_ptr.vmem [resolvable:$true] %s4_s11 }
   0x3   :  { %s20_s12 = scalar_lea.vmem %s5_s11, 2048  ;;  %p25_p1 = scmp.lt.s32.totalorder %s5_s11, %s5_s11 }
   0x4   :  { %p21_p0 = scmp.ne.s32.totalorder %s5_s11, %s20_s12  ;;  %p26_p2 = scmp.lt.s32.totalorder %s20_s12, %s20_s12 }
   0x6   :  { %p27_p3 = por %p26_p2, %p25_p1 }
   0x8   :  { %p28_p4 = pnand %p27_p3, %p21_p0 }
   0xa   :  { %31 = shalt.err (!%p28_p4)  }
   0xb   :  { %7 = dma.hbm_to_vmem [thread:$0]  %s2_s8, 2048, %s5_s11, [#allocation0] }
   0xc   :  { %33 = dma.done.wait [#allocation0], 2048  }
   0xd   :  { %34 = vsyncadd [#allocation0], 4294965248 }
   0xe   :  { %9 = vsyncpa [#allocation0], 1 }

// kernel: custom-call
= control target key start
LH: loop header
LB: loop body
LE: loop exit
PB: predicated region body
PF: predicated region fallthrough
CT: control target
= control target key end

     0   :  { %2 = vsyncpa [#allocation0], 0  ;;  %s47_s0 = inlined_call_operand.hbm [shape: c64[2,4,16,16], index: 0, kind: input, shape index: {}]   ;;  %s48_s1 = inlined_call_operand.vmem [shape: f32[2,4,16,16], index: 1, kind: output, shape index: {}]  }
   0x1   :  { %s3_s8 = sshll.u32 %s48_s1, 4  ;;  %s4_s8 = int_to_ptr.vmem [resolvable:$true] %s3_s8 }
   0x2   :  { %s17_s9 = scalar_lea.vmem %s4_s8, 2048  ;;  %p22_p1 = scmp.lt.s32.totalorder %s4_s8, %s4_s8 }
   0x3   :  { %p18_p0 = scmp.ne.s32.totalorder %s4_s8, %s17_s9  ;;  %p23_p2 = scmp.lt.s32.totalorder %s17_s9, %s17_s9 }
   0x5   :  { %p24_p3 = por %p23_p2, %p22_p1 }
   0x7   :  { %p25_p4 = pnand %p24_p3, %p18_p0 }
   0x9   :  { %28 = shalt.err (!%p25_p4)  }
   0xa   :  { %6 = dma.hbm_to_vmem [thread:$0]  %s47_s0, 2048, %s4_s8, [#allocation0] }
   0xb   :  { %29 = dma.done.wait [#allocation0], 2048  }
   0xc   :  { %30 = vsyncadd [#allocation0], 4294965248 }
   0xd   :  { %8 = vsyncpa [#allocation0], 1 }

// kernel: custom-call.2
= control target key start
LH: loop header
LB: loop body
LE: loop exit
PB: predicated region body
PF: predicated region fallthrough
CT: control target
= control target key end

     0   :  { %s6412_s0 = inlined_call_operand.vmem [shape: f32[2,4,32,32], index: 0, kind: input, shape index: {}]   ;;  %s6413_s2 = inlined_call_operand.vmem [shape: c64[2,4,32,32], index: 2, kind: output, shape index: {}]   ;;  %s6414_s1 = inlined_call_operand.vmem [shape: f32[2,4,32,32], index: 1, kind: input, shape index: {}]  }
   0x1   :  { %v5_v0 = vld [vmem:[%s6412_s0] sm:$0xff]  ;;  %v2304_v1 = vld [vmem:[%s6412_s0 + $0x8] sm:$0xff]  ;;  %v2306_v2 = vld [vmem:[%s6412_s0 + $0x10] sm:$0xff] }
   0x2   :  { %6 = vst [vmem:[%s6413_s2] sm:$0xff] %v5_v0  ;;  %2305 = vst [vmem:[%s6413_s2 + $0x8] sm:$0xff] %v2304_v1  ;;  %v2308_v3 = vld [vmem:[%s6412_s0 + $0x18] sm:$0xff]  ;;  %v2310_v4 = vld [vmem:[%s6412_s0 + $0x20] sm:$0xff] }
   0x3   :  { %2307 = vst [vmem:[%s6413_s2 + $0x10] sm:$0xff] %v2306_v2  ;;  %v2312_v5 = vld [vmem:[%s6412_s0 + $0x28] sm:$0xff]  ;;  %2309 = vst [vmem:[%s6413_s2 + $0x18] sm:$0xff] %v2308_v3  ;;  %v2314_v6 = vld [vmem:[%s6412_s0 + $0x30] sm:$0xff] }
   0x4   :  { %2311 = vst [vmem:[%s6413_s2 + $0x20] sm:$0xff] %v2310_v4  ;;  %2313 = vst [vmem:[%s6413_s2 + $0x28] sm:$0xff] %v2312_v5  ;;  %v2316_v7 = vld [vmem:[%s6412_s0 + $0x38] sm:$0xff]  ;;  %v2318_v8 = vld [vmem:[%s6412_s0 + $0x40] sm:$0xff] }
   0x5   :  { %2315 = vst [vmem:[%s6413_s2 + $0x30] sm:$0xff] %v2314_v6  ;;  %2317 = vst [vmem:[%s6413_s2 + $0x38] sm:$0xff] %v2316_v7  ;;  %v2320_v9 = vld [vmem:[%s6412_s0 + $0x48] sm:$0xff]  ;;  %v2322_v10 = vld [vmem:[%s6412_s0 + $0x50] sm:$0xff] }
   0x6   :  { %2319 = vst [vmem:[%s6413_s2 + $0x40] sm:$0xff] %v2318_v8  ;;  %v2324_v11 = vld [vmem:[%s6412_s0 + $0x58] sm:$0xff]  ;;  %2321 = vst [vmem:[%s6413_s2 + $0x48] sm:$0xff] %v2320_v9  ;;  %v2326_v12 = vld [vmem:[%s6412_s0 + $0x60] sm:$0xff] }
   0x7   :  { %2323 = vst [vmem:[%s6413_s2 + $0x50] sm:$0xff] %v2322_v10  ;;  %2325 = vst [vmem:[%s6413_s2 + $0x58] sm:$0xff] %v2324_v11  ;;  %v2328_v13 = vld [vmem:[%s6412_s0 + $0x68] sm:$0xff]  ;;  %v2330_v14 = vld [vmem:[%s6412_s0 + $0x70] sm:$0xff] }
   0x8   :  { %2327 = vst [vmem:[%s6413_s2 + $0x60] sm:$0xff] %v2326_v12  ;;  %2329 = vst [vmem:[%s6413_s2 + $0x68] sm:$0xff] %v2328_v13  ;;  %v2332_v15 = vld [vmem:[%s6412_s0 + $0x78] sm:$0xff]  ;;  %v2334_v16 = vld [vmem:[%s6412_s0 + $0x80] sm:$0xff] }
   0x9   :  { %2331 = vst [vmem:[%s6413_s2 + $0x70] sm:$0xff] %v2330_v14  ;;  %v2336_v17 = vld [vmem:[%s6412_s0 + $0x88] sm:$0xff]  ;;  %2333 = vst [vmem:[%s6413_s2 + $0x78] sm:$0xff] %v2332_v15  ;;  %v2338_v18 = vld [vmem:[%s6412_s0 + $0x90] sm:$0xff] }
   0xa   :  { %2335 = vst [vmem:[%s6413_s2 + $0x80] sm:$0xff] %v2334_v16  ;;  %2337 = vst [vmem:[%s6413_s2 + $0x88] sm:$0xff] %v2336_v17  ;;  %v2340_v19 = vld [vmem:[%s6412_s0 + $0x98] sm:$0xff]  ;;  %v2342_v20 = vld [vmem:[%s6412_s0 + $0xa0] sm:$0xff] }
   0xb   :  { %2339 = vst [vmem:[%s6413_s2 + $0x90] sm:$0xff] %v2338_v18  ;;  %2341 = vst [vmem:[%s6413_s2 + $0x98] sm:$0xff] %v2340_v19  ;;  %v2344_v21 = vld [vmem:[%s6412_s0 + $0xa8] sm:$0xff]  ;;  %v2346_v22 = vld [vmem:[%s6412_s0 + $0xb0] sm:$0xff] }
   0xc   :  { %2343 = vst [vmem:[%s6413_s2 + $0xa0] sm:$0xff] %v2342_v20  ;;  %v2348_v23 = vld [vmem:[%s6412_s0 + $0xb8] sm:$0xff]  ;;  %2345 = vst [vmem:[%s6413_s2 + $0xa8] sm:$0xff] %v2344_v21  ;;  %v2350_v24 = vld [vmem:[%s6412_s0 + $0xc0] sm:$0xff] }
   0xd   :  { %2347 = vst [vmem:[%s6413_s2 + $0xb0] sm:$0xff] %v2346_v22  ;;  %2349 = vst [vmem:[%s6413_s2 + $0xb8] sm:$0xff] %v2348_v23  ;;  %v2352_v25 = vld [vmem:[%s6412_s0 + $0xc8] sm:$0xff]  ;;  %v2354_v26 = vld [vmem:[%s6412_s0 + $0xd0] sm:$0xff] }
   0xe   :  { %2351 = vst [vmem:[%s6413_s2 + $0xc0] sm:$0xff] %v2350_v24  ;;  %2353 = vst [vmem:[%s6413_s2 + $0xc8] sm:$0xff] %v2352_v25  ;;  %v2356_v27 = vld [vmem:[%s6412_s0 + $0xd8] sm:$0xff]  ;;  %v2358_v28 = vld [vmem:[%s6412_s0 + $0xe0] sm:$0xff] }
   0xf   :  { %2355 = vst [vmem:[%s6413_s2 + $0xd0] sm:$0xff] %v2354_v26  ;;  %v2360_v29 = vld [vmem:[%s6412_s0 + $0xe8] sm:$0xff]  ;;  %2357 = vst [vmem:[%s6413_s2 + $0xd8] sm:$0xff] %v2356_v27  ;;  %v2362_v30 = vld [vmem:[%s6412_s0 + $0xf0] sm:$0xff] }
  0x10   :  { %2359 = vst [vmem:[%s6413_s2 + $0xe0] sm:$0xff] %v2358_v28  ;;  %2361 = vst [vmem:[%s6413_s2 + $0xe8] sm:$0xff] %v2360_v29  ;;  %v2364_v31 = vld [vmem:[%s6412_s0 + $0xf8] sm:$0xff]  ;;  %v2366_v32 = vld [vmem:[%s6412_s0 + $0x100] sm:$0xff] }
  0x11   :  { %2363 = vst [vmem:[%s6413_s2 + $0xf0] sm:$0xff] %v2362_v30  ;;  %2365 = vst [vmem:[%s6413_s2 + $0xf8] sm:$0xff] %v2364_v31  ;;  %v2368_v33 = vld [vmem:[%s6412_s0 + $0x108] sm:$0xff]  ;;  %v2370_v34 = vld [vmem:[%s6412_s0 + $0x110] sm:$0xff] }
  0x12   :  { %2367 = vst [vmem:[%s6413_s2 + $0x100] sm:$0xff] %v2366_v32  ;;  %v2372_v35 = vld [vmem:[%s6412_s0 + $0x118] sm:$0xff]  ;;  %2369 = vst [vmem:[%s6413_s2 + $0x108] sm:$0xff] %v2368_v33  ;;  %v2374_v36 = vld [vmem:[%s6412_s0 + $0x120] sm:$0xff] }
  0x13   :  { %2371 = vst [vmem:[%s6413_s2 + $0x110] sm:$0xff] %v2370_v34  ;;  %2373 = vst [vmem:[%s6413_s2 + $0x118] sm:$0xff] %v2372_v35  ;;  %v2376_v37 = vld [vmem:[%s6412_s0 + $0x128] sm:$0xff]  ;;  %v2378_v38 = vld [vmem:[%s6412_s0 + $0x130] sm:$0xff] }
  0x14   :  { %2375 = vst [vmem:[%s6413_s2 + $0x120] sm:$0xff] %v2374_v36  ;;  %2377 = vst [vmem:[%s6413_s2 + $0x128] sm:$0xff] %v2376_v37  ;;  %v2380_v39 = vld [vmem:[%s6412_s0 + $0x138] sm:$0xff]  ;;  %v2382_v40 = vld [vmem:[%s6412_s0 + $0x140] sm:$0xff] }
  0x15   :  { %2379 = vst [vmem:[%s6413_s2 + $0x130] sm:$0xff] %v2378_v38  ;;  %v2384_v41 = vld [vmem:[%s6412_s0 + $0x148] sm:$0xff]  ;;  %2381 = vst [vmem:[%s6413_s2 + $0x138] sm:$0xff] %v2380_v39  ;;  %v2386_v42 = vld [vmem:[%s6412_s0 + $0x150] sm:$0xff] }
  0x16   :  { %2383 = vst [vmem:[%s6413_s2 + $0x140] sm:$0xff] %v2382_v40  ;;  %2385 = vst [vmem:[%s6413_s2 + $0x148] sm:$0xff] %v2384_v41  ;;  %v2388_v43 = vld [vmem:[%s6412_s0 + $0x158] sm:$0xff]  ;;  %v2390_v44 = vld [vmem:[%s6412_s0 + $0x160] sm:$0xff] }
  0x17   :  { %2387 = vst [vmem:[%s6413_s2 + $0x150] sm:$0xff] %v2386_v42  ;;  %2389 = vst [vmem:[%s6413_s2 + $0x158] sm:$0xff] %v2388_v43  ;;  %v2392_v45 = vld [vmem:[%s6412_s0 + $0x168] sm:$0xff]  ;;  %v2394_v46 = vld [vmem:[%s6412_s0 + $0x170] sm:$0xff] }
  0x18   :  { %2391 = vst [vmem:[%s6413_s2 + $0x160] sm:$0xff] %v2390_v44  ;;  %v2396_v47 = vld [vmem:[%s6412_s0 + $0x178] sm:$0xff]  ;;  %2393 = vst [vmem:[%s6413_s2 + $0x168] sm:$0xff] %v2392_v45  ;;  %v2398_v48 = vld [vmem:[%s6412_s0 + $0x180] sm:$0xff] }
  0x19   :  { %2395 = vst [vmem:[%s6413_s2 + $0x170] sm:$0xff] %v2394_v46  ;;  %2397 = vst [vmem:[%s6413_s2 + $0x178] sm:$0xff] %v2396_v47  ;;  %v2400_v49 = vld [vmem:[%s6412_s0 + $0x188] sm:$0xff]  ;;  %v2402_v50 = vld [vmem:[%s6412_s0 + $0x190] sm:$0xff] }
  0x1a   :  { %2399 = vst [vmem:[%s6413_s2 + $0x180] sm:$0xff] %v2398_v48  ;;  %2401 = vst [vmem:[%s6413_s2 + $0x188] sm:$0xff] %v2400_v49  ;;  %v2404_v51 = vld [vmem:[%s6412_s0 + $0x198] sm:$0xff]  ;;  %v2406_v52 = vld [vmem:[%s6412_s0 + $0x1a0] sm:$0xff] }
  0x1b   :  { %2403 = vst [vmem:[%s6413_s2 + $0x190] sm:$0xff] %v2402_v50  ;;  %v2408_v53 = vld [vmem:[%s6412_s0 + $0x1a8] sm:$0xff]  ;;  %2405 = vst [vmem:[%s6413_s2 + $0x198] sm:$0xff] %v2404_v51  ;;  %v2410_v54 = vld [vmem:[%s6412_s0 + $0x1b0] sm:$0xff] }
  0x1c   :  { %2407 = vst [vmem:[%s6413_s2 + $0x1a0] sm:$0xff] %v2406_v52  ;;  %2409 = vst [vmem:[%s6413_s2 + $0x1a8] sm:$0xff] %v2408_v53  ;;  %v2412_v55 = vld [vmem:[%s6412_s0 + $0x1b8] sm:$0xff]  ;;  %v2414_v56 = vld [vmem:[%s6412_s0 + $0x1c0] sm:$0xff] }
  0x1d   :  { %2411 = vst [vmem:[%s6413_s2 + $0x1b0] sm:$0xff] %v2410_v54  ;;  %2413 = vst [vmem:[%s6413_s2 + $0x1b8] sm:$0xff] %v2412_v55  ;;  %v2416_v57 = vld [vmem:[%s6412_s0 + $0x1c8] sm:$0xff]  ;;  %v2418_v58 = vld [vmem:[%s6412_s0 + $0x1d0] sm:$0xff] }
  0x1e   :  { %2415 = vst [vmem:[%s6413_s2 + $0x1c0] sm:$0xff] %v2414_v56  ;;  %v2420_v59 = vld [vmem:[%s6412_s0 + $0x1d8] sm:$0xff]  ;;  %2417 = vst [vmem:[%s6413_s2 + $0x1c8] sm:$0xff] %v2416_v57  ;;  %v2422_v60 = vld [vmem:[%s6412_s0 + $0x1e0] sm:$0xff] }
  0x1f   :  { %2419 = vst [vmem:[%s6413_s2 + $0x1d0] sm:$0xff] %v2418_v58  ;;  %2421 = vst [vmem:[%s6413_s2 + $0x1d8] sm:$0xff] %v2420_v59  ;;  %v2424_v61 = vld [vmem:[%s6412_s0 + $0x1e8] sm:$0xff]  ;;  %v2426_v62 = vld [vmem:[%s6412_s0 + $0x1f0] sm:$0xff] }
  0x20   :  { %2423 = vst [vmem:[%s6413_s2 + $0x1e0] sm:$0xff] %v2422_v60  ;;  %2425 = vst [vmem:[%s6413_s2 + $0x1e8] sm:$0xff] %v2424_v61  ;;  %v2428_v63 = vld [vmem:[%s6412_s0 + $0x1f8] sm:$0xff]  ;;  %v2430_v0 = vld [vmem:[%s6412_s0 + $0x200] sm:$0xff] }
  0x21   :  { %2427 = vst [vmem:[%s6413_s2 + $0x1f0] sm:$0xff] %v2426_v62  ;;  %v2432_v1 = vld [vmem:[%s6412_s0 + $0x208] sm:$0xff]  ;;  %2429 = vst [vmem:[%s6413_s2 + $0x1f8] sm:$0xff] %v2428_v63  ;;  %v2434_v2 = vld [vmem:[%s6412_s0 + $0x210] sm:$0xff] }
  0x22   :  { %2431 = vst [vmem:[%s6413_s2 + $0x200] sm:$0xff] %v2430_v0  ;;  %2433 = vst [vmem:[%s6413_s2 + $0x208] sm:$0xff] %v2432_v1  ;;  %v2436_v3 = vld [vmem:[%s6412_s0 + $0x218] sm:$0xff]  ;;  %v2438_v4 = vld [vmem:[%s6412_s0 + $0x220] sm:$0xff] }
  0x23   :  { %2435 = vst [vmem:[%s6413_s2 + $0x210] sm:$0xff] %v2434_v2  ;;  %2437 = vst [vmem:[%s6413_s2 + $0x218] sm:$0xff] %v2436_v3  ;;  %v2440_v5 = vld [vmem:[%s6412_s0 + $0x228] sm:$0xff]  ;;  %v2442_v6 = vld [vmem:[%s6412_s0 + $0x230] sm:$0xff] }
  0x24   :  { %2439 = vst [vmem:[%s6413_s2 + $0x220] sm:$0xff] %v2438_v4  ;;  %v2444_v7 = vld [vmem:[%s6412_s0 + $0x238] sm:$0xff]  ;;  %2441 = vst [vmem:[%s6413_s2 + $0x228] sm:$0xff] %v2440_v5  ;;  %v2446_v8 = vld [vmem:[%s6412_s0 + $0x240] sm:$0xff] }
  0x25   :  { %2443 = vst [vmem:[%s6413_s2 + $0x230] sm:$0xff] %v2442_v6  ;;  %2445 = vst [vmem:[%s6413_s2 + $0x238] sm:$0xff] %v2444_v7  ;;  %v2448_v9 = vld [vmem:[%s6412_s0 + $0x248] sm:$0xff]  ;;  %v2450_v10 = vld [vmem:[%s6412_s0 + $0x250] sm:$0xff] }
  0x26   :  { %2447 = vst [vmem:[%s6413_s2 + $0x240] sm:$0xff] %v2446_v8  ;;  %2449 = vst [vmem:[%s6413_s2 + $0x248] sm:$0xff] %v2448_v9  ;;  %v2452_v11 = vld [vmem:[%s6412_s0 + $0x258] sm:$0xff]  ;;  %v2454_v12 = vld [vmem:[%s6412_s0 + $0x260] sm:$0xff] }
  0x27   :  { %2451 = vst [vmem:[%s6413_s2 + $0x250] sm:$0xff] %v2450_v10  ;;  %v2456_v13 = vld [vmem:[%s6412_s0 + $0x268] sm:$0xff]  ;;  %2453 = vst [vmem:[%s6413_s2 + $0x258] sm:$0xff] %v2452_v11  ;;  %v2458_v14 = vld [vmem:[%s6412_s0 + $0x270] sm:$0xff] }
  0x28   :  { %2455 = vst [vmem:[%s6413_s2 + $0x260] sm:$0xff] %v2454_v12  ;;  %2457 = vst [vmem:[%s6413_s2 + $0x268] sm:$0xff] %v2456_v13  ;;  %v2460_v15 = vld [vmem:[%s6412_s0 + $0x278] sm:$0xff]  ;;  %v2462_v16 = vld [vmem:[%s6412_s0 + $0x280] sm:$0xff] }
  0x29   :  { %2459 = vst [vmem:[%s6413_s2 + $0x270] sm:$0xff] %v2458_v14  ;;  %2461 = vst [vmem:[%s6413_s2 + $0x278] sm:$0xff] %v2460_v15  ;;  %v2464_v17 = vld [vmem:[%s6412_s0 + $0x288] sm:$0xff]  ;;  %v2466_v18 = vld [vmem:[%s6412_s0 + $0x290] sm:$0xff] }
  0x2a   :  { %2463 = vst [vmem:[%s6413_s2 + $0x280] sm:$0xff] %v2462_v16  ;;  %v2468_v19 = vld [vmem:[%s6412_s0 + $0x298] sm:$0xff]  ;;  %2465 = vst [vmem:[%s6413_s2 + $0x288] sm:$0xff] %v2464_v17  ;;  %v2470_v20 = vld [vmem:[%s6412_s0 + $0x2a0] sm:$0xff] }
  0x2b   :  { %2467 = vst [vmem:[%s6413_s2 + $0x290] sm:$0xff] %v2466_v18  ;;  %2469 = vst [vmem:[%s6413_s2 + $0x298] sm:$0xff] %v2468_v19  ;;  %v2472_v21 = vld [vmem:[%s6412_s0 + $0x2a8] sm:$0xff]  ;;  %v2474_v22 = vld [vmem:[%s6412_s0 + $0x2b0] sm:$0xff] }
  0x2c   :  { %2471 = vst [vmem:[%s6413_s2 + $0x2a0] sm:$0xff] %v2470_v20  ;;  %2473 = vst [vmem:[%s6413_s2 + $0x2a8] sm:$0xff] %v2472_v21  ;;  %v2476_v23 = vld [vmem:[%s6412_s0 + $0x2b8] sm:$0xff]  ;;  %v2478_v24 = vld [vmem:[%s6412_s0 + $0x2c0] sm:$0xff] }
  0x2d   :  { %2475 = vst [vmem:[%s6413_s2 + $0x2b0] sm:$0xff] %v2474_v22  ;;  %v2480_v25 = vld [vmem:[%s6412_s0 + $0x2c8] sm:$0xff]  ;;  %2477 = vst [vmem:[%s6413_s2 + $0x2b8] sm:$0xff] %v2476_v23  ;;  %v2482_v26 = vld [vmem:[%s6412_s0 + $0x2d0] sm:$0xff] }
  0x2e   :  { %2479 = vst [vmem:[%s6413_s2 + $0x2c0] sm:$0xff] %v2478_v24  ;;  %2481 = vst [vmem:[%s6413_s2 + $0x2c8] sm:$0xff] %v2480_v25  ;;  %v2484_v27 = vld [vmem:[%s6412_s0 + $0x2d8] sm:$0xff]  ;;  %v2486_v28 = vld [vmem:[%s6412_s0 + $0x2e0] sm:$0xff] }
  0x2f   :  { %2483 = vst [vmem:[%s6413_s2 + $0x2d0] sm:$0xff] %v2482_v26  ;;  %2485 = vst [vmem:[%s6413_s2 + $0x2d8] sm:$0xff] %v2484_v27  ;;  %v2488_v29 = vld [vmem:[%s6412_s0 + $0x2e8] sm:$0xff]  ;;  %v2490_v30 = vld [vmem:[%s6412_s0 + $0x2f0] sm:$0xff] }
  0x30   :  { %2487 = vst [vmem:[%s6413_s2 + $0x2e0] sm:$0xff] %v2486_v28  ;;  %v2492_v31 = vld [vmem:[%s6412_s0 + $0x2f8] sm:$0xff]  ;;  %2489 = vst [vmem:[%s6413_s2 + $0x2e8] sm:$0xff] %v2488_v29  ;;  %v2494_v32 = vld [vmem:[%s6412_s0 + $0x300] sm:$0xff] }
  0x31   :  { %2491 = vst [vmem:[%s6413_s2 + $0x2f0] sm:$0xff] %v2490_v30  ;;  %2493 = vst [vmem:[%s6413_s2 + $0x2f8] sm:$0xff] %v2492_v31  ;;  %v2496_v33 = vld [vmem:[%s6412_s0 + $0x308] sm:$0xff]  ;;  %v2498_v34 = vld [vmem:[%s6412_s0 + $0x310] sm:$0xff] }
  0x32   :  { %2495 = vst [vmem:[%s6413_s2 + $0x300] sm:$0xff] %v2494_v32  ;;  %2497 = vst [vmem:[%s6413_s2 + $0x308] sm:$0xff] %v2496_v33  ;;  %v2500_v35 = vld [vmem:[%s6412_s0 + $0x318] sm:$0xff]  ;;  %v2502_v36 = vld [vmem:[%s6412_s0 + $0x320] sm:$0xff] }
  0x33   :  { %2499 = vst [vmem:[%s6413_s2 + $0x310] sm:$0xff] %v2498_v34  ;;  %v2504_v37 = vld [vmem:[%s6412_s0 + $0x328] sm:$0xff]  ;;  %2501 = vst [vmem:[%s6413_s2 + $0x318] sm:$0xff] %v2500_v35  ;;  %v2506_v38 = vld [vmem:[%s6412_s0 + $0x330] sm:$0xff] }
  0x34   :  { %2503 = vst [vmem:[%s6413_s2 + $0x320] sm:$0xff] %v2502_v36  ;;  %2505 = vst [vmem:[%s6413_s2 + $0x328] sm:$0xff] %v2504_v37  ;;  %v2508_v39 = vld [vmem:[%s6412_s0 + $0x338] sm:$0xff]  ;;  %v2510_v40 = vld [vmem:[%s6412_s0 + $0x340] sm:$0xff] }
  0x35   :  { %2507 = vst [vmem:[%s6413_s2 + $0x330] sm:$0xff] %v2506_v38  ;;  %2509 = vst [vmem:[%s6413_s2 + $0x338] sm:$0xff] %v2508_v39  ;;  %v2512_v41 = vld [vmem:[%s6412_s0 + $0x348] sm:$0xff]  ;;  %v2514_v42 = vld [vmem:[%s6412_s0 + $0x350] sm:$0xff] }
  0x36   :  { %2511 = vst [vmem:[%s6413_s2 + $0x340] sm:$0xff] %v2510_v40  ;;  %v2516_v43 = vld [vmem:[%s6412_s0 + $0x358] sm:$0xff]  ;;  %2513 = vst [vmem:[%s6413_s2 + $0x348] sm:$0xff] %v2512_v41  ;;  %v2518_v44 = vld [vmem:[%s6412_s0 + $0x360] sm:$0xff] }
  0x37   :  { %2515 = vst [vmem:[%s6413_s2 + $0x350] sm:$0xff] %v2514_v42  ;;  %2517 = vst [vmem:[%s6413_s2 + $0x358] sm:$0xff] %v2516_v43  ;;  %v2520_v45 = vld [vmem:[%s6412_s0 + $0x368] sm:$0xff]  ;;  %v2522_v46 = vld [vmem:[%s6412_s0 + $0x370] sm:$0xff] }
  0x38   :  { %2519 = vst [vmem:[%s6413_s2 + $0x360] sm:$0xff] %v2518_v44  ;;  %2521 = vst [vmem:[%s6413_s2 + $0x368] sm:$0xff] %v2520_v45  ;;  %v2524_v47 = vld [vmem:[%s6412_s0 + $0x378] sm:$0xff]  ;;  %v2526_v48 = vld [vmem:[%s6412_s0 + $0x380] sm:$0xff] }
  0x39   :  { %2523 = vst [vmem:[%s6413_s2 + $0x370] sm:$0xff] %v2522_v46  ;;  %v2528_v49 = vld [vmem:[%s6412_s0 + $0x388] sm:$0xff]  ;;  %2525 = vst [vmem:[%s6413_s2 + $0x378] sm:$0xff] %v2524_v47  ;;  %v2530_v50 = vld [vmem:[%s6412_s0 + $0x390] sm:$0xff] }
  0x3a   :  { %2527 = vst [vmem:[%s6413_s2 + $0x380] sm:$0xff] %v2526_v48  ;;  %2529 = vst [vmem:[%s6413_s2 + $0x388] sm:$0xff] %v2528_v49  ;;  %v2532_v51 = vld [vmem:[%s6412_s0 + $0x398] sm:$0xff]  ;;  %v2534_v52 = vld [vmem:[%s6412_s0 + $0x3a0] sm:$0xff] }
  0x3b   :  { %2531 = vst [vmem:[%s6413_s2 + $0x390] sm:$0xff] %v2530_v50  ;;  %2533 = vst [vmem:[%s6413_s2 + $0x398] sm:$0xff] %v2532_v51  ;;  %v2536_v53 = vld [vmem:[%s6412_s0 + $0x3a8] sm:$0xff]  ;;  %v2538_v54 = vld [vmem:[%s6412_s0 + $0x3b0] sm:$0xff] }
  0x3c   :  { %2535 = vst [vmem:[%s6413_s2 + $0x3a0] sm:$0xff] %v2534_v52  ;;  %v2540_v55 = vld [vmem:[%s6412_s0 + $0x3b8] sm:$0xff]  ;;  %2537 = vst [vmem:[%s6413_s2 + $0x3a8] sm:$0xff] %v2536_v53  ;;  %v2542_v56 = vld [vmem:[%s6412_s0 + $0x3c0] sm:$0xff] }
  0x3d   :  { %2539 = vst [vmem:[%s6413_s2 + $0x3b0] sm:$0xff] %v2538_v54  ;;  %2541 = vst [vmem:[%s6413_s2 + $0x3b8] sm:$0xff] %v2540_v55  ;;  %v2544_v57 = vld [vmem:[%s6412_s0 + $0x3c8] sm:$0xff]  ;;  %v2546_v58 = vld [vmem:[%s6412_s0 + $0x3d0] sm:$0xff] }
  0x3e   :  { %2543 = vst [vmem:[%s6413_s2 + $0x3c0] sm:$0xff] %v2542_v56  ;;  %2545 = vst [vmem:[%s6413_s2 + $0x3c8] sm:$0xff] %v2544_v57  ;;  %v2548_v59 = vld [vmem:[%s6412_s0 + $0x3d8] sm:$0xff]  ;;  %v2550_v60 = vld [vmem:[%s6412_s0 + $0x3e0] sm:$0xff] }
  0x3f   :  { %2547 = vst [vmem:[%s6413_s2 + $0x3d0] sm:$0xff] %v2546_v58  ;;  %v2552_v61 = vld [vmem:[%s6412_s0 + $0x3e8] sm:$0xff]  ;;  %2549 = vst [vmem:[%s6413_s2 + $0x3d8] sm:$0xff] %v2548_v59  ;;  %v2554_v62 = vld [vmem:[%s6412_s0 + $0x3f0] sm:$0xff] }
  0x40   :  { %2551 = vst [vmem:[%s6413_s2 + $0x3e0] sm:$0xff] %v2550_v60  ;;  %2553 = vst [vmem:[%s6413_s2 + $0x3e8] sm:$0xff] %v2552_v61  ;;  %v2556_v63 = vld [vmem:[%s6412_s0 + $0x3f8] sm:$0xff]  ;;  %v2558_v0 = vld [vmem:[%s6412_s0 + $0x400] sm:$0xff] }
  0x41   :  { %2555 = vst [vmem:[%s6413_s2 + $0x3f0] sm:$0xff] %v2554_v62  ;;  %2557 = vst [vmem:[%s6413_s2 + $0x3f8] sm:$0xff] %v2556_v63  ;;  %v2560_v1 = vld [vmem:[%s6412_s0 + $0x408] sm:$0xff]  ;;  %v2562_v2 = vld [vmem:[%s6412_s0 + $0x410] sm:$0xff] }
  0x42   :  { %2559 = vst [vmem:[%s6413_s2 + $0x400] sm:$0xff] %v2558_v0  ;;  %v2564_v3 = vld [vmem:[%s6412_s0 + $0x418] sm:$0xff]  ;;  %2561 = vst [vmem:[%s6413_s2 + $0x408] sm:$0xff] %v2560_v1  ;;  %v2566_v4 = vld [vmem:[%s6412_s0 + $0x420] sm:$0xff] }
  0x43   :  { %2563 = vst [vmem:[%s6413_s2 + $0x410] sm:$0xff] %v2562_v2  ;;  %2565 = vst [vmem:[%s6413_s2 + $0x418] sm:$0xff] %v2564_v3  ;;  %v2568_v5 = vld [vmem:[%s6412_s0 + $0x428] sm:$0xff]  ;;  %v2570_v6 = vld [vmem:[%s6412_s0 + $0x430] sm:$0xff] }
  0x44   :  { %2567 = vst [vmem:[%s6413_s2 + $0x420] sm:$0xff] %v2566_v4  ;;  %2569 = vst [vmem:[%s6413_s2 + $0x428] sm:$0xff] %v2568_v5  ;;  %v2572_v7 = vld [vmem:[%s6412_s0 + $0x438] sm:$0xff]  ;;  %v2574_v8 = vld [vmem:[%s6412_s0 + $0x440] sm:$0xff] }
  0x45   :  { %2571 = vst [vmem:[%s6413_s2 + $0x430] sm:$0xff] %v2570_v6  ;;  %v2576_v9 = vld [vmem:[%s6412_s0 + $0x448] sm:$0xff]  ;;  %2573 = vst [vmem:[%s6413_s2 + $0x438] sm:$0xff] %v2572_v7  ;;  %v2578_v10 = vld [vmem:[%s6412_s0 + $0x450] sm:$0xff] }
  0x46   :  { %2575 = vst [vmem:[%s6413_s2 + $0x440] sm:$0xff] %v2574_v8  ;;  %2577 = vst [vmem:[%s6413_s2 + $0x448] sm:$0xff] %v2576_v9  ;;  %v2580_v11 = vld [vmem:[%s6412_s0 + $0x458] sm:$0xff]  ;;  %v2582_v12 = vld [vmem:[%s6412_s0 + $0x460] sm:$0xff] }
  0x47   :  { %2579 = vst [vmem:[%s6413_s2 + $0x450] sm:$0xff] %v2578_v10  ;;  %2581 = vst [vmem:[%s6413_s2 + $0x458] sm:$0xff] %v2580_v11  ;;  %v2584_v13 = vld [vmem:[%s6412_s0 + $0x468] sm:$0xff]  ;;  %v2586_v14 = vld [vmem:[%s6412_s0 + $0x470] sm:$0xff] }
  0x48   :  { %2583 = vst [vmem:[%s6413_s2 + $0x460] sm:$0xff] %v2582_v12  ;;  %v2588_v15 = vld [vmem:[%s6412_s0 + $0x478] sm:$0xff]  ;;  %2585 = vst [vmem:[%s6413_s2 + $0x468] sm:$0xff] %v2584_v13  ;;  %v2590_v16 = vld [vmem:[%s6412_s0 + $0x480] sm:$0xff] }
  0x49   :  { %2587 = vst [vmem:[%s6413_s2 + $0x470] sm:$0xff] %v2586_v14  ;;  %2589 = vst [vmem:[%s6413_s2 + $0x478] sm:$0xff] %v2588_v15  ;;  %v2592_v17 = vld [vmem:[%s6412_s0 + $0x488] sm:$0xff]  ;;  %v2594_v18 = vld [vmem:[%s6412_s0 + $0x490] sm:$0xff] }
  0x4a   :  { %2591 = vst [vmem:[%s6413_s2 + $0x480] sm:$0xff] %v2590_v16  ;;  %2593 = vst [vmem:[%s6413_s2 + $0x488] sm:$0xff] %v2592_v17  ;;  %v2596_v19 = vld [vmem:[%s6412_s0 + $0x498] sm:$0xff]  ;;  %v2598_v20 = vld [vmem:[%s6412_s0 + $0x4a0] sm:$0xff] }
  0x4b   :  { %2595 = vst [vmem:[%s6413_s2 + $0x490] sm:$0xff] %v2594_v18  ;;  %v2600_v21 = vld [vmem:[%s6412_s0 + $0x4a8] sm:$0xff]  ;;  %2597 = vst [vmem:[%s6413_s2 + $0x498] sm:$0xff] %v2596_v19  ;;  %v2602_v22 = vld [vmem:[%s6412_s0 + $0x4b0] sm:$0xff] }
  0x4c   :  { %2599 = vst [vmem:[%s6413_s2 + $0x4a0] sm:$0xff] %v2598_v20  ;;  %2601 = vst [vmem:[%s6413_s2 + $0x4a8] sm:$0xff] %v2600_v21  ;;  %v2604_v23 = vld [vmem:[%s6412_s0 + $0x4b8] sm:$0xff]  ;;  %v2606_v24 = vld [vmem:[%s6412_s0 + $0x4c0] sm:$0xff] }
  0x4d   :  { %2603 = vst [vmem:[%s6413_s2 + $0x4b0] sm:$0xff] %v2602_v22  ;;  %2605 = vst [vmem:[%s6413_s2 + $0x4b8] sm:$0xff] %v2604_v23  ;;  %v2608_v25 = vld [vmem:[%s6412_s0 + $0x4c8] sm:$0xff]  ;;  %v2610_v26 = vld [vmem:[%s6412_s0 + $0x4d0] sm:$0xff] }
  0x4e   :  { %2607 = vst [vmem:[%s6413_s2 + $0x4c0] sm:$0xff] %v2606_v24  ;;  %v2612_v27 = vld [vmem:[%s6412_s0 + $0x4d8] sm:$0xff]  ;;  %2609 = vst [vmem:[%s6413_s2 + $0x4c8] sm:$0xff] %v2608_v25  ;;  %v2614_v28 = vld [vmem:[%s6412_s0 + $0x4e0] sm:$0xff] }
  0x4f   :  { %2611 = vst [vmem:[%s6413_s2 + $0x4d0] sm:$0xff] %v2610_v26  ;;  %2613 = vst [vmem:[%s6413_s2 + $0x4d8] sm:$0xff] %v2612_v27  ;;  %v2616_v29 = vld [vmem:[%s6412_s0 + $0x4e8] sm:$0xff]  ;;  %v2618_v30 = vld [vmem:[%s6412_s0 + $0x4f0] sm:$0xff] }
  0x50   :  { %2615 = vst [vmem:[%s6413_s2 + $0x4e0] sm:$0xff] %v2614_v28  ;;  %2617 = vst [vmem:[%s6413_s2 + $0x4e8] sm:$0xff] %v2616_v29  ;;  %v2620_v31 = vld [vmem:[%s6412_s0 + $0x4f8] sm:$0xff]  ;;  %v2622_v32 = vld [vmem:[%s6412_s0 + $0x500] sm:$0xff] }
  0x51   :  { %2619 = vst [vmem:[%s6413_s2 + $0x4f0] sm:$0xff] %v2618_v30  ;;  %v2624_v33 = vld [vmem:[%s6412_s0 + $0x508] sm:$0xff]  ;;  %2621 = vst [vmem:[%s6413_s2 + $0x4f8] sm:$0xff] %v2620_v31  ;;  %v2626_v34 = vld [vmem:[%s6412_s0 + $0x510] sm:$0xff] }
  0x52   :  { %2623 = vst [vmem:[%s6413_s2 + $0x500] sm:$0xff] %v2622_v32  ;;  %2625 = vst [vmem:[%s6413_s2 + $0x508] sm:$0xff] %v2624_v33  ;;  %v2628_v35 = vld [vmem:[%s6412_s0 + $0x518] sm:$0xff]  ;;  %v2630_v36 = vld [vmem:[%s6412_s0 + $0x520] sm:$0xff] }
  0x53   :  { %2627 = vst [vmem:[%s6413_s2 + $0x510] sm:$0xff] %v2626_v34  ;;  %2629 = vst [vmem:[%s6413_s2 + $0x518] sm:$0xff] %v2628_v35  ;;  %v2632_v37 = vld [vmem:[%s6412_s0 + $0x528] sm:$0xff]  ;;  %v2634_v38 = vld [vmem:[%s6412_s0 + $0x530] sm:$0xff] }
  0x54   :  { %2631 = vst [vmem:[%s6413_s2 + $0x520] sm:$0xff] %v2630_v36  ;;  %v2636_v39 = vld [vmem:[%s6412_s0 + $0x538] sm:$0xff]  ;;  %2633 = vst [vmem:[%s6413_s2 + $0x528] sm:$0xff] %v2632_v37  ;;  %v2638_v40 = vld [vmem:[%s6412_s0 + $0x540] sm:$0xff] }
  0x55   :  { %2635 = vst [vmem:[%s6413_s2 + $0x530] sm:$0xff] %v2634_v38  ;;  %2637 = vst [vmem:[%s6413_s2 + $0x538] sm:$0xff] %v2636_v39  ;;  %v2640_v41 = vld [vmem:[%s6412_s0 + $0x548] sm:$0xff]  ;;  %v2642_v42 = vld [vmem:[%s6412_s0 + $0x550] sm:$0xff] }
  0x56   :  { %2639 = vst [vmem:[%s6413_s2 + $0x540] sm:$0xff] %v2638_v40  ;;  %2641 = vst [vmem:[%s6413_s2 + $0x548] sm:$0xff] %v2640_v41  ;;  %v2644_v43 = vld [vmem:[%s6412_s0 + $0x558] sm:$0xff]  ;;  %v2646_v44 = vld [vmem:[%s6412_s0 + $0x560] sm:$0xff] }
  0x57   :  { %2643 = vst [vmem:[%s6413_s2 + $0x550] sm:$0xff] %v2642_v42  ;;  %v2648_v45 = vld [vmem:[%s6412_s0 + $0x568] sm:$0xff]  ;;  %2645 = vst [vmem:[%s6413_s2 + $0x558] sm:$0xff] %v2644_v43  ;;  %v2650_v46 = vld [vmem:[%s6412_s0 + $0x570] sm:$0xff] }
  0x58   :  { %2647 = vst [vmem:[%s6413_s2 + $0x560] sm:$0xff] %v2646_v44  ;;  %2649 = vst [vmem:[%s6413_s2 + $0x568] sm:$0xff] %v2648_v45  ;;  %v2652_v47 = vld [vmem:[%s6412_s0 + $0x578] sm:$0xff]  ;;  %v2654_v48 = vld [vmem:[%s6412_s0 + $0x580] sm:$0xff] }
  0x59   :  { %2651 = vst [vmem:[%s6413_s2 + $0x570] sm:$0xff] %v2650_v46  ;;  %2653 = vst [vmem:[%s6413_s2 + $0x578] sm:$0xff] %v2652_v47  ;;  %v2656_v49 = vld [vmem:[%s6412_s0 + $0x588] sm:$0xff]  ;;  %v2658_v50 = vld [vmem:[%s6412_s0 + $0x590] sm:$0xff] }
  0x5a   :  { %2655 = vst [vmem:[%s6413_s2 + $0x580] sm:$0xff] %v2654_v48  ;;  %v2660_v51 = vld [vmem:[%s6412_s0 + $0x598] sm:$0xff]  ;;  %2657 = vst [vmem:[%s6413_s2 + $0x588] sm:$0xff] %v2656_v49  ;;  %v2662_v52 = vld [vmem:[%s6412_s0 + $0x5a0] sm:$0xff] }
  0x5b   :  { %2659 = vst [vmem:[%s6413_s2 + $0x590] sm:$0xff] %v2658_v50  ;;  %2661 = vst [vmem:[%s6413_s2 + $0x598] sm:$0xff] %v2660_v51  ;;  %v2664_v53 = vld [vmem:[%s6412_s0 + $0x5a8] sm:$0xff]  ;;  %v2666_v54 = vld [vmem:[%s6412_s0 + $0x5b0] sm:$0xff] }
  0x5c   :  { %2663 = vst [vmem:[%s6413_s2 + $0x5a0] sm:$0xff] %v2662_v52  ;;  %2665 = vst [vmem:[%s6413_s2 + $0x5a8] sm:$0xff] %v2664_v53  ;;  %v2668_v55 = vld [vmem:[%s6412_s0 + $0x5b8] sm:$0xff]  ;;  %v2670_v56 = vld [vmem:[%s6412_s0 + $0x5c0] sm:$0xff] }
  0x5d   :  { %2667 = vst [vmem:[%s6413_s2 + $0x5b0] sm:$0xff] %v2666_v54  ;;  %v2672_v57 = vld [vmem:[%s6412_s0 + $0x5c8] sm:$0xff]  ;;  %2669 = vst [vmem:[%s6413_s2 + $0x5b8] sm:$0xff] %v2668_v55  ;;  %v2674_v58 = vld [vmem:[%s6412_s0 + $0x5d0] sm:$0xff] }
  0x5e   :  { %2671 = vst [vmem:[%s6413_s2 + $0x5c0] sm:$0xff] %v2670_v56  ;;  %2673 = vst [vmem:[%s6413_s2 + $0x5c8] sm:$0xff] %v2672_v57  ;;  %v2676_v59 = vld [vmem:[%s6412_s0 + $0x5d8] sm:$0xff]  ;;  %v2678_v60 = vld [vmem:[%s6412_s0 + $0x5e0] sm:$0xff] }
  0x5f   :  { %2675 = vst [vmem:[%s6413_s2 + $0x5d0] sm:$0xff] %v2674_v58  ;;  %2677 = vst [vmem:[%s6413_s2 + $0x5d8] sm:$0xff] %v2676_v59  ;;  %v2680_v61 = vld [vmem:[%s6412_s0 + $0x5e8] sm:$0xff]  ;;  %v2682_v62 = vld [vmem:[%s6412_s0 + $0x5f0] sm:$0xff] }
  0x60   :  { %2679 = vst [vmem:[%s6413_s2 + $0x5e0] sm:$0xff] %v2678_v60  ;;  %v2684_v63 = vld [vmem:[%s6412_s0 + $0x5f8] sm:$0xff]  ;;  %2681 = vst [vmem:[%s6413_s2 + $0x5e8] sm:$0xff] %v2680_v61  ;;  %v2686_v0 = vld [vmem:[%s6412_s0 + $0x600] sm:$0xff] }
  0x61   :  { %2683 = vst [vmem:[%s6413_s2 + $0x5f0] sm:$0xff] %v2682_v62  ;;  %2685 = vst [vmem:[%s6413_s2 + $0x5f8] sm:$0xff] %v2684_v63  ;;  %v2688_v1 = vld [vmem:[%s6412_s0 + $0x608] sm:$0xff]  ;;  %v2690_v2 = vld [vmem:[%s6412_s0 + $0x610] sm:$0xff] }
  0x62   :  { %2687 = vst [vmem:[%s6413_s2 + $0x600] sm:$0xff] %v2686_v0  ;;  %2689 = vst [vmem:[%s6413_s2 + $0x608] sm:$0xff] %v2688_v1  ;;  %v2692_v3 = vld [vmem:[%s6412_s0 + $0x618] sm:$0xff]  ;;  %v2694_v4 = vld [vmem:[%s6412_s0 + $0x620] sm:$0xff] }
  0x63   :  { %2691 = vst [vmem:[%s6413_s2 + $0x610] sm:$0xff] %v2690_v2  ;;  %v2696_v5 = vld [vmem:[%s6412_s0 + $0x628] sm:$0xff]  ;;  %2693 = vst [vmem:[%s6413_s2 + $0x618] sm:$0xff] %v2692_v3  ;;  %v2698_v6 = vld [vmem:[%s6412_s0 + $0x630] sm:$0xff] }
  0x64   :  { %2695 = vst [vmem:[%s6413_s2 + $0x620] sm:$0xff] %v2694_v4  ;;  %2697 = vst [vmem:[%s6413_s2 + $0x628] sm:$0xff] %v2696_v5  ;;  %v2700_v7 = vld [vmem:[%s6412_s0 + $0x638] sm:$0xff]  ;;  %v2702_v8 = vld [vmem:[%s6412_s0 + $0x640] sm:$0xff] }
  0x65   :  { %2699 = vst [vmem:[%s6413_s2 + $0x630] sm:$0xff] %v2698_v6  ;;  %2701 = vst [vmem:[%s6413_s2 + $0x638] sm:$0xff] %v2700_v7  ;;  %v2704_v9 = vld [vmem:[%s6412_s0 + $0x648] sm:$0xff]  ;;  %v2706_v10 = vld [vmem:[%s6412_s0 + $0x650] sm:$0xff] }
  0x66   :  { %2703 = vst [vmem:[%s6413_s2 + $0x640] sm:$0xff] %v2702_v8  ;;  %v2708_v11 = vld [vmem:[%s6412_s0 + $0x658] sm:$0xff]  ;;  %2705 = vst [vmem:[%s6413_s2 + $0x648] sm:$0xff] %v2704_v9  ;;  %v2710_v12 = vld [vmem:[%s6412_s0 + $0x660] sm:$0xff] }
  0x67   :  { %2707 = vst [vmem:[%s6413_s2 + $0x650] sm:$0xff] %v2706_v10  ;;  %2709 = vst [vmem:[%s6413_s2 + $0x658] sm:$0xff] %v2708_v11  ;;  %v2712_v13 = vld [vmem:[%s6412_s0 + $0x668] sm:$0xff]  ;;  %v2714_v14 = vld [vmem:[%s6412_s0 + $0x670] sm:$0xff] }
  0x68   :  { %2711 = vst [vmem:[%s6413_s2 + $0x660] sm:$0xff] %v2710_v12  ;;  %2713 = vst [vmem:[%s6413_s2 + $0x668] sm:$0xff] %v2712_v13  ;;  %v2716_v15 = vld [vmem:[%s6412_s0 + $0x678] sm:$0xff]  ;;  %v2718_v16 = vld [vmem:[%s6412_s0 + $0x680] sm:$0xff] }
  0x69   :  { %2715 = vst [vmem:[%s6413_s2 + $0x670] sm:$0xff] %v2714_v14  ;;  %v2720_v17 = vld [vmem:[%s6412_s0 + $0x688] sm:$0xff]  ;;  %2717 = vst [vmem:[%s6413_s2 + $0x678] sm:$0xff] %v2716_v15  ;;  %v2722_v18 = vld [vmem:[%s6412_s0 + $0x690] sm:$0xff] }
  0x6a   :  { %2719 = vst [vmem:[%s6413_s2 + $0x680] sm:$0xff] %v2718_v16  ;;  %2721 = vst [vmem:[%s6413_s2 + $0x688] sm:$0xff] %v2720_v17  ;;  %v2724_v19 = vld [vmem:[%s6412_s0 + $0x698] sm:$0xff]  ;;  %v2726_v20 = vld [vmem:[%s6412_s0 + $0x6a0] sm:$0xff] }
  0x6b   :  { %2723 = vst [vmem:[%s6413_s2 + $0x690] sm:$0xff] %v2722_v18  ;;  %2725 = vst [vmem:[%s6413_s2 + $0x698] sm:$0xff] %v2724_v19  ;;  %v2728_v21 = vld [vmem:[%s6412_s0 + $0x6a8] sm:$0xff]  ;;  %v2730_v22 = vld [vmem:[%s6412_s0 + $0x6b0] sm:$0xff] }
  0x6c   :  { %2727 = vst [vmem:[%s6413_s2 + $0x6a0] sm:$0xff] %v2726_v20  ;;  %v2732_v23 = vld [vmem:[%s6412_s0 + $0x6b8] sm:$0xff]  ;;  %2729 = vst [vmem:[%s6413_s2 + $0x6a8] sm:$0xff] %v2728_v21  ;;  %v2734_v24 = vld [vmem:[%s6412_s0 + $0x6c0] sm:$0xff] }
  0x6d   :  { %2731 = vst [vmem:[%s6413_s2 + $0x6b0] sm:$0xff] %v2730_v22  ;;  %2733 = vst [vmem:[%s6413_s2 + $0x6b8] sm:$0xff] %v2732_v23  ;;  %v2736_v25 = vld [vmem:[%s6412_s0 + $0x6c8] sm:$0xff]  ;;  %v2738_v26 = vld [vmem:[%s6412_s0 + $0x6d0] sm:$0xff] }
  0x6e   :  { %2735 = vst [vmem:[%s6413_s2 + $0x6c0] sm:$0xff] %v2734_v24  ;;  %2737 = vst [vmem:[%s6413_s2 + $0x6c8] sm:$0xff] %v2736_v25  ;;  %v2740_v27 = vld [vmem:[%s6412_s0 + $0x6d8] sm:$0xff]  ;;  %v2742_v28 = vld [vmem:[%s6412_s0 + $0x6e0] sm:$0xff] }
  0x6f   :  { %2739 = vst [vmem:[%s6413_s2 + $0x6d0] sm:$0xff] %v2738_v26  ;;  %v2744_v29 = vld [vmem:[%s6412_s0 + $0x6e8] sm:$0xff]  ;;  %2741 = vst [vmem:[%s6413_s2 + $0x6d8] sm:$0xff] %v2740_v27  ;;  %v2746_v30 = vld [vmem:[%s6412_s0 + $0x6f0] sm:$0xff] }
  0x70   :  { %2743 = vst [vmem:[%s6413_s2 + $0x6e0] sm:$0xff] %v2742_v28  ;;  %2745 = vst [vmem:[%s6413_s2 + $0x6e8] sm:$0xff] %v2744_v29  ;;  %v2748_v31 = vld [vmem:[%s6412_s0 + $0x6f8] sm:$0xff]  ;;  %v2750_v32 = vld [vmem:[%s6412_s0 + $0x700] sm:$0xff] }
  0x71   :  { %2747 = vst [vmem:[%s6413_s2 + $0x6f0] sm:$0xff] %v2746_v30  ;;  %2749 = vst [vmem:[%s6413_s2 + $0x6f8] sm:$0xff] %v2748_v31  ;;  %v2752_v33 = vld [vmem:[%s6412_s0 + $0x708] sm:$0xff]  ;;  %v2754_v34 = vld [vmem:[%s6412_s0 + $0x710] sm:$0xff] }
  0x72   :  { %2751 = vst [vmem:[%s6413_s2 + $0x700] sm:$0xff] %v2750_v32  ;;  %v2756_v35 = vld [vmem:[%s6412_s0 + $0x718] sm:$0xff]  ;;  %2753 = vst [vmem:[%s6413_s2 + $0x708] sm:$0xff] %v2752_v33  ;;  %v2758_v36 = vld [vmem:[%s6412_s0 + $0x720] sm:$0xff] }
  0x73   :  { %2755 = vst [vmem:[%s6413_s2 + $0x710] sm:$0xff] %v2754_v34  ;;  %2757 = vst [vmem:[%s6413_s2 + $0x718] sm:$0xff] %v2756_v35  ;;  %v2760_v37 = vld [vmem:[%s6412_s0 + $0x728] sm:$0xff]  ;;  %v2762_v38 = vld [vmem:[%s6412_s0 + $0x730] sm:$0xff] }
  0x74   :  { %2759 = vst [vmem:[%s6413_s2 + $0x720] sm:$0xff] %v2758_v36  ;;  %2761 = vst [vmem:[%s6413_s2 + $0x728] sm:$0xff] %v2760_v37  ;;  %v2764_v39 = vld [vmem:[%s6412_s0 + $0x738] sm:$0xff]  ;;  %v2766_v40 = vld [vmem:[%s6412_s0 + $0x740] sm:$0xff] }
  0x75   :  { %2763 = vst [vmem:[%s6413_s2 + $0x730] sm:$0xff] %v2762_v38  ;;  %v2768_v41 = vld [vmem:[%s6412_s0 + $0x748] sm:$0xff]  ;;  %2765 = vst [vmem:[%s6413_s2 + $0x738] sm:$0xff] %v2764_v39  ;;  %v2770_v42 = vld [vmem:[%s6412_s0 + $0x750] sm:$0xff] }
  0x76   :  { %2767 = vst [vmem:[%s6413_s2 + $0x740] sm:$0xff] %v2766_v40  ;;  %2769 = vst [vmem:[%s6413_s2 + $0x748] sm:$0xff] %v2768_v41  ;;  %v2772_v43 = vld [vmem:[%s6412_s0 + $0x758] sm:$0xff]  ;;  %v2774_v44 = vld [vmem:[%s6412_s0 + $0x760] sm:$0xff] }
  0x77   :  { %2771 = vst [vmem:[%s6413_s2 + $0x750] sm:$0xff] %v2770_v42  ;;  %2773 = vst [vmem:[%s6413_s2 + $0x758] sm:$0xff] %v2772_v43  ;;  %v2776_v45 = vld [vmem:[%s6412_s0 + $0x768] sm:$0xff]  ;;  %v2778_v46 = vld [vmem:[%s6412_s0 + $0x770] sm:$0xff] }
  0x78   :  { %2775 = vst [vmem:[%s6413_s2 + $0x760] sm:$0xff] %v2774_v44  ;;  %v2780_v47 = vld [vmem:[%s6412_s0 + $0x778] sm:$0xff]  ;;  %2777 = vst [vmem:[%s6413_s2 + $0x768] sm:$0xff] %v2776_v45  ;;  %v2782_v48 = vld [vmem:[%s6412_s0 + $0x780] sm:$0xff] }
  0x79   :  { %2779 = vst [vmem:[%s6413_s2 + $0x770] sm:$0xff] %v2778_v46  ;;  %2781 = vst [vmem:[%s6413_s2 + $0x778] sm:$0xff] %v2780_v47  ;;  %v2784_v49 = vld [vmem:[%s6412_s0 + $0x788] sm:$0xff]  ;;  %v2786_v50 = vld [vmem:[%s6412_s0 + $0x790] sm:$0xff] }
  0x7a   :  { %2783 = vst [vmem:[%s6413_s2 + $0x780] sm:$0xff] %v2782_v48  ;;  %2785 = vst [vmem:[%s6413_s2 + $0x788] sm:$0xff] %v2784_v49  ;;  %v2788_v51 = vld [vmem:[%s6412_s0 + $0x798] sm:$0xff]  ;;  %v2790_v52 = vld [vmem:[%s6412_s0 + $0x7a0] sm:$0xff] }
  0x7b   :  { %2787 = vst [vmem:[%s6413_s2 + $0x790] sm:$0xff] %v2786_v50  ;;  %v2792_v53 = vld [vmem:[%s6412_s0 + $0x7a8] sm:$0xff]  ;;  %2789 = vst [vmem:[%s6413_s2 + $0x798] sm:$0xff] %v2788_v51  ;;  %v2794_v54 = vld [vmem:[%s6412_s0 + $0x7b0] sm:$0xff] }
  0x7c   :  { %2791 = vst [vmem:[%s6413_s2 + $0x7a0] sm:$0xff] %v2790_v52  ;;  %2793 = vst [vmem:[%s6413_s2 + $0x7a8] sm:$0xff] %v2792_v53  ;;  %v2796_v55 = vld [vmem:[%s6412_s0 + $0x7b8] sm:$0xff]  ;;  %v2798_v56 = vld [vmem:[%s6412_s0 + $0x7c0] sm:$0xff] }
  0x7d   :  { %2795 = vst [vmem:[%s6413_s2 + $0x7b0] sm:$0xff] %v2794_v54  ;;  %2797 = vst [vmem:[%s6413_s2 + $0x7b8] sm:$0xff] %v2796_v55  ;;  %v2800_v57 = vld [vmem:[%s6412_s0 + $0x7c8] sm:$0xff]  ;;  %v2802_v58 = vld [vmem:[%s6412_s0 + $0x7d0] sm:$0xff] }
  0x7e   :  { %2799 = vst [vmem:[%s6413_s2 + $0x7c0] sm:$0xff] %v2798_v56  ;;  %v2804_v59 = vld [vmem:[%s6412_s0 + $0x7d8] sm:$0xff]  ;;  %2801 = vst [vmem:[%s6413_s2 + $0x7c8] sm:$0xff] %v2800_v57  ;;  %v2806_v60 = vld [vmem:[%s6412_s0 + $0x7e0] sm:$0xff] }
  0x7f   :  { %2803 = vst [vmem:[%s6413_s2 + $0x7d0] sm:$0xff] %v2802_v58  ;;  %2805 = vst [vmem:[%s6413_s2 + $0x7d8] sm:$0xff] %v2804_v59  ;;  %v2808_v61 = vld [vmem:[%s6412_s0 + $0x7e8] sm:$0xff]  ;;  %v2810_v62 = vld [vmem:[%s6412_s0 + $0x7f0] sm:$0xff] }
  0x80   :  { %2807 = vst [vmem:[%s6413_s2 + $0x7e0] sm:$0xff] %v2806_v60  ;;  %2809 = vst [vmem:[%s6413_s2 + $0x7e8] sm:$0xff] %v2808_v61  ;;  %v2812_v63 = vld [vmem:[%s6412_s0 + $0x7f8] sm:$0xff]  ;;  %v1027_v0 = vld [vmem:[%s6414_s1] sm:$0xff] }
  0x81   :  { %2811 = vst [vmem:[%s6413_s2 + $0x7f0] sm:$0xff] %v2810_v62  ;;  %v2815_v1 = vld [vmem:[%s6414_s1 + $0x8] sm:$0xff]  ;;  %2813 = vst [vmem:[%s6413_s2 + $0x7f8] sm:$0xff] %v2812_v63  ;;  %v2817_v2 = vld [vmem:[%s6414_s1 + $0x10] sm:$0xff] }
  0x82   :  { %2814 = vst [vmem:[%s6413_s2 + $0x800] sm:$0xff] %v1027_v0  ;;  %2816 = vst [vmem:[%s6413_s2 + $0x808] sm:$0xff] %v2815_v1  ;;  %v2819_v3 = vld [vmem:[%s6414_s1 + $0x18] sm:$0xff]  ;;  %v2821_v4 = vld [vmem:[%s6414_s1 + $0x20] sm:$0xff] }
  0x83   :  { %2818 = vst [vmem:[%s6413_s2 + $0x810] sm:$0xff] %v2817_v2  ;;  %2820 = vst [vmem:[%s6413_s2 + $0x818] sm:$0xff] %v2819_v3  ;;  %v2823_v5 = vld [vmem:[%s6414_s1 + $0x28] sm:$0xff]  ;;  %v2825_v6 = vld [vmem:[%s6414_s1 + $0x30] sm:$0xff] }
  0x84   :  { %2822 = vst [vmem:[%s6413_s2 + $0x820] sm:$0xff] %v2821_v4  ;;  %v2827_v7 = vld [vmem:[%s6414_s1 + $0x38] sm:$0xff]  ;;  %2824 = vst [vmem:[%s6413_s2 + $0x828] sm:$0xff] %v2823_v5  ;;  %v2829_v8 = vld [vmem:[%s6414_s1 + $0x40] sm:$0xff] }
  0x85   :  { %2826 = vst [vmem:[%s6413_s2 + $0x830] sm:$0xff] %v2825_v6  ;;  %2828 = vst [vmem:[%s6413_s2 + $0x838] sm:$0xff] %v2827_v7  ;;  %v2831_v9 = vld [vmem:[%s6414_s1 + $0x48] sm:$0xff]  ;;  %v2833_v10 = vld [vmem:[%s6414_s1 + $0x50] sm:$0xff] }
  0x86   :  { %2830 = vst [vmem:[%s6413_s2 + $0x840] sm:$0xff] %v2829_v8  ;;  %2832 = vst [vmem:[%s6413_s2 + $0x848] sm:$0xff] %v2831_v9  ;;  %v2835_v11 = vld [vmem:[%s6414_s1 + $0x58] sm:$0xff]  ;;  %v2837_v12 = vld [vmem:[%s6414_s1 + $0x60] sm:$0xff] }
  0x87   :  { %2834 = vst [vmem:[%s6413_s2 + $0x850] sm:$0xff] %v2833_v10  ;;  %v2839_v13 = vld [vmem:[%s6414_s1 + $0x68] sm:$0xff]  ;;  %2836 = vst [vmem:[%s6413_s2 + $0x858] sm:$0xff] %v2835_v11  ;;  %v2841_v14 = vld [vmem:[%s6414_s1 + $0x70] sm:$0xff] }
  0x88   :  { %2838 = vst [vmem:[%s6413_s2 + $0x860] sm:$0xff] %v2837_v12  ;;  %2840 = vst [vmem:[%s6413_s2 + $0x868] sm:$0xff] %v2839_v13  ;;  %v2843_v15 = vld [vmem:[%s6414_s1 + $0x78] sm:$0xff]  ;;  %v2845_v16 = vld [vmem:[%s6414_s1 + $0x80] sm:$0xff] }
  0x89   :  { %2842 = vst [vmem:[%s6413_s2 + $0x870] sm:$0xff] %v2841_v14  ;;  %2844 = vst [vmem:[%s6413_s2 + $0x878] sm:$0xff] %v2843_v15  ;;  %v2847_v17 = vld [vmem:[%s6414_s1 + $0x88] sm:$0xff]  ;;  %v2849_v18 = vld [vmem:[%s6414_s1 + $0x90] sm:$0xff] }
  0x8a   :  { %2846 = vst [vmem:[%s6413_s2 + $0x880] sm:$0xff] %v2845_v16  ;;  %v2851_v19 = vld [vmem:[%s6414_s1 + $0x98] sm:$0xff]  ;;  %2848 = vst [vmem:[%s6413_s2 + $0x888] sm:$0xff] %v2847_v17  ;;  %v2853_v20 = vld [vmem:[%s6414_s1 + $0xa0] sm:$0xff] }
  0x8b   :  { %2850 = vst [vmem:[%s6413_s2 + $0x890] sm:$0xff] %v2849_v18  ;;  %2852 = vst [vmem:[%s6413_s2 + $0x898] sm:$0xff] %v2851_v19  ;;  %v2855_v21 = vld [vmem:[%s6414_s1 + $0xa8] sm:$0xff]  ;;  %v2857_v22 = vld [vmem:[%s6414_s1 + $0xb0] sm:$0xff] }
  0x8c   :  { %2854 = vst [vmem:[%s6413_s2 + $0x8a0] sm:$0xff] %v2853_v20  ;;  %2856 = vst [vmem:[%s6413_s2 + $0x8a8] sm:$0xff] %v2855_v21  ;;  %v2859_v23 = vld [vmem:[%s6414_s1 + $0xb8] sm:$0xff]  ;;  %v2861_v24 = vld [vmem:[%s6414_s1 + $0xc0] sm:$0xff] }
  0x8d   :  { %2858 = vst [vmem:[%s6413_s2 + $0x8b0] sm:$0xff] %v2857_v22  ;;  %v2863_v25 = vld [vmem:[%s6414_s1 + $0xc8] sm:$0xff]  ;;  %2860 = vst [vmem:[%s6413_s2 + $0x8b8] sm:$0xff] %v2859_v23  ;;  %v2865_v26 = vld [vmem:[%s6414_s1 + $0xd0] sm:$0xff] }
  0x8e   :  { %2862 = vst [vmem:[%s6413_s2 + $0x8c0] sm:$0xff] %v2861_v24  ;;  %2864 = vst [vmem:[%s6413_s2 + $0x8c8] sm:$0xff] %v2863_v25  ;;  %v2867_v27 = vld [vmem:[%s6414_s1 + $0xd8] sm:$0xff]  ;;  %v2869_v28 = vld [vmem:[%s6414_s1 + $0xe0] sm:$0xff] }
  0x8f   :  { %2866 = vst [vmem:[%s6413_s2 + $0x8d0] sm:$0xff] %v2865_v26  ;;  %2868 = vst [vmem:[%s6413_s2 + $0x8d8] sm:$0xff] %v2867_v27  ;;  %v2871_v29 = vld [vmem:[%s6414_s1 + $0xe8] sm:$0xff]  ;;  %v2873_v30 = vld [vmem:[%s6414_s1 + $0xf0] sm:$0xff] }
  0x90   :  { %2870 = vst [vmem:[%s6413_s2 + $0x8e0] sm:$0xff] %v2869_v28  ;;  %v2875_v31 = vld [vmem:[%s6414_s1 + $0xf8] sm:$0xff]  ;;  %2872 = vst [vmem:[%s6413_s2 + $0x8e8] sm:$0xff] %v2871_v29  ;;  %v2877_v32 = vld [vmem:[%s6414_s1 + $0x100] sm:$0xff] }
  0x91   :  { %2874 = vst [vmem:[%s6413_s2 + $0x8f0] sm:$0xff] %v2873_v30  ;;  %2876 = vst [vmem:[%s6413_s2 + $0x8f8] sm:$0xff] %v2875_v31  ;;  %v2879_v33 = vld [vmem:[%s6414_s1 + $0x108] sm:$0xff]  ;;  %v2881_v34 = vld [vmem:[%s6414_s1 + $0x110] sm:$0xff] }
  0x92   :  { %2878 = vst [vmem:[%s6413_s2 + $0x900] sm:$0xff] %v2877_v32  ;;  %2880 = vst [vmem:[%s6413_s2 + $0x908] sm:$0xff] %v2879_v33  ;;  %v2883_v35 = vld [vmem:[%s6414_s1 + $0x118] sm:$0xff]  ;;  %v2885_v36 = vld [vmem:[%s6414_s1 + $0x120] sm:$0xff] }
  0x93   :  { %2882 = vst [vmem:[%s6413_s2 + $0x910] sm:$0xff] %v2881_v34  ;;  %v2887_v37 = vld [vmem:[%s6414_s1 + $0x128] sm:$0xff]  ;;  %2884 = vst [vmem:[%s6413_s2 + $0x918] sm:$0xff] %v2883_v35  ;;  %v2889_v38 = vld [vmem:[%s6414_s1 + $0x130] sm:$0xff] }
  0x94   :  { %2886 = vst [vmem:[%s6413_s2 + $0x920] sm:$0xff] %v2885_v36  ;;  %2888 = vst [vmem:[%s6413_s2 + $0x928] sm:$0xff] %v2887_v37  ;;  %v2891_v39 = vld [vmem:[%s6414_s1 + $0x138] sm:$0xff]  ;;  %v2893_v40 = vld [vmem:[%s6414_s1 + $0x140] sm:$0xff] }
  0x95   :  { %2890 = vst [vmem:[%s6413_s2 + $0x930] sm:$0xff] %v2889_v38  ;;  %2892 = vst [vmem:[%s6413_s2 + $0x938] sm:$0xff] %v2891_v39  ;;  %v2895_v41 = vld [vmem:[%s6414_s1 + $0x148] sm:$0xff]  ;;  %v2897_v42 = vld [vmem:[%s6414_s1 + $0x150] sm:$0xff] }
  0x96   :  { %2894 = vst [vmem:[%s6413_s2 + $0x940] sm:$0xff] %v2893_v40  ;;  %v2899_v43 = vld [vmem:[%s6414_s1 + $0x158] sm:$0xff]  ;;  %2896 = vst [vmem:[%s6413_s2 + $0x948] sm:$0xff] %v2895_v41  ;;  %v2901_v44 = vld [vmem:[%s6414_s1 + $0x160] sm:$0xff] }
  0x97   :  { %2898 = vst [vmem:[%s6413_s2 + $0x950] sm:$0xff] %v2897_v42  ;;  %2900 = vst [vmem:[%s6413_s2 + $0x958] sm:$0xff] %v2899_v43  ;;  %v2903_v45 = vld [vmem:[%s6414_s1 + $0x168] sm:$0xff]  ;;  %v2905_v46 = vld [vmem:[%s6414_s1 + $0x170] sm:$0xff] }
  0x98   :  { %2902 = vst [vmem:[%s6413_s2 + $0x960] sm:$0xff] %v2901_v44  ;;  %2904 = vst [vmem:[%s6413_s2 + $0x968] sm:$0xff] %v2903_v45  ;;  %v2907_v47 = vld [vmem:[%s6414_s1 + $0x178] sm:$0xff]  ;;  %v2909_v48 = vld [vmem:[%s6414_s1 + $0x180] sm:$0xff] }
  0x99   :  { %2906 = vst [vmem:[%s6413_s2 + $0x970] sm:$0xff] %v2905_v46  ;;  %v2911_v49 = vld [vmem:[%s6414_s1 + $0x188] sm:$0xff]  ;;  %2908 = vst [vmem:[%s6413_s2 + $0x978] sm:$0xff] %v2907_v47  ;;  %v2913_v50 = vld [vmem:[%s6414_s1 + $0x190] sm:$0xff] }
  0x9a   :  { %2910 = vst [vmem:[%s6413_s2 + $0x980] sm:$0xff] %v2909_v48  ;;  %2912 = vst [vmem:[%s6413_s2 + $0x988] sm:$0xff] %v2911_v49  ;;  %v2915_v51 = vld [vmem:[%s6414_s1 + $0x198] sm:$0xff]  ;;  %v2917_v52 = vld [vmem:[%s6414_s1 + $0x1a0] sm:$0xff] }
  0x9b   :  { %2914 = vst [vmem:[%s6413_s2 + $0x990] sm:$0xff] %v2913_v50  ;;  %2916 = vst [vmem:[%s6413_s2 + $0x998] sm:$0xff] %v2915_v51  ;;  %v2919_v53 = vld [vmem:[%s6414_s1 + $0x1a8] sm:$0xff]  ;;  %v2921_v54 = vld [vmem:[%s6414_s1 + $0x1b0] sm:$0xff] }
  0x9c   :  { %2918 = vst [vmem:[%s6413_s2 + $0x9a0] sm:$0xff] %v2917_v52  ;;  %v2923_v55 = vld [vmem:[%s6414_s1 + $0x1b8] sm:$0xff]  ;;  %2920 = vst [vmem:[%s6413_s2 + $0x9a8] sm:$0xff] %v2919_v53  ;;  %v2925_v56 = vld [vmem:[%s6414_s1 + $0x1c0] sm:$0xff] }
  0x9d   :  { %2922 = vst [vmem:[%s6413_s2 + $0x9b0] sm:$0xff] %v2921_v54  ;;  %2924 = vst [vmem:[%s6413_s2 + $0x9b8] sm:$0xff] %v2923_v55  ;;  %v2927_v57 = vld [vmem:[%s6414_s1 + $0x1c8] sm:$0xff]  ;;  %v2929_v58 = vld [vmem:[%s6414_s1 + $0x1d0] sm:$0xff] }
  0x9e   :  { %2926 = vst [vmem:[%s6413_s2 + $0x9c0] sm:$0xff] %v2925_v56  ;;  %2928 = vst [vmem:[%s6413_s2 + $0x9c8] sm:$0xff] %v2927_v57  ;;  %v2931_v59 = vld [vmem:[%s6414_s1 + $0x1d8] sm:$0xff]  ;;  %v2933_v60 = vld [vmem:[%s6414_s1 + $0x1e0] sm:$0xff] }
  0x9f   :  { %2930 = vst [vmem:[%s6413_s2 + $0x9d0] sm:$0xff] %v2929_v58  ;;  %v2935_v61 = vld [vmem:[%s6414_s1 + $0x1e8] sm:$0xff]  ;;  %2932 = vst [vmem:[%s6413_s2 + $0x9d8] sm:$0xff] %v2931_v59  ;;  %v2937_v62 = vld [vmem:[%s6414_s1 + $0x1f0] sm:$0xff] }
  0xa0   :  { %2934 = vst [vmem:[%s6413_s2 + $0x9e0] sm:$0xff] %v2933_v60  ;;  %2936 = vst [vmem:[%s6413_s2 + $0x9e8] sm:$0xff] %v2935_v61  ;;  %v2939_v63 = vld [vmem:[%s6414_s1 + $0x1f8] sm:$0xff]  ;;  %v2941_v0 = vld [vmem:[%s6414_s1 + $0x200] sm:$0xff] }
  0xa1   :  { %2938 = vst [vmem:[%s6413_s2 + $0x9f0] sm:$0xff] %v2937_v62  ;;  %2940 = vst [vmem:[%s6413_s2 + $0x9f8] sm:$0xff] %v2939_v63  ;;  %v2943_v1 = vld [vmem:[%s6414_s1 + $0x208] sm:$0xff]  ;;  %v2945_v2 = vld [vmem:[%s6414_s1 + $0x210] sm:$0xff] }
  0xa2   :  { %2942 = vst [vmem:[%s6413_s2 + $0xa00] sm:$0xff] %v2941_v0  ;;  %v2947_v3 = vld [vmem:[%s6414_s1 + $0x218] sm:$0xff]  ;;  %2944 = vst [vmem:[%s6413_s2 + $0xa08] sm:$0xff] %v2943_v1  ;;  %v2949_v4 = vld [vmem:[%s6414_s1 + $0x220] sm:$0xff] }
  0xa3   :  { %2946 = vst [vmem:[%s6413_s2 + $0xa10] sm:$0xff] %v2945_v2  ;;  %2948 = vst [vmem:[%s6413_s2 + $0xa18] sm:$0xff] %v2947_v3  ;;  %v2951_v5 = vld [vmem:[%s6414_s1 + $0x228] sm:$0xff]  ;;  %v2953_v6 = vld [vmem:[%s6414_s1 + $0x230] sm:$0xff] }
  0xa4   :  { %2950 = vst [vmem:[%s6413_s2 + $0xa20] sm:$0xff] %v2949_v4  ;;  %2952 = vst [vmem:[%s6413_s2 + $0xa28] sm:$0xff] %v2951_v5  ;;  %v2955_v7 = vld [vmem:[%s6414_s1 + $0x238] sm:$0xff]  ;;  %v2957_v8 = vld [vmem:[%s6414_s1 + $0x240] sm:$0xff] }
  0xa5   :  { %2954 = vst [vmem:[%s6413_s2 + $0xa30] sm:$0xff] %v2953_v6  ;;  %v2959_v9 = vld [vmem:[%s6414_s1 + $0x248] sm:$0xff]  ;;  %2956 = vst [vmem:[%s6413_s2 + $0xa38] sm:$0xff] %v2955_v7  ;;  %v2961_v10 = vld [vmem:[%s6414_s1 + $0x250] sm:$0xff] }
  0xa6   :  { %2958 = vst [vmem:[%s6413_s2 + $0xa40] sm:$0xff] %v2957_v8  ;;  %2960 = vst [vmem:[%s6413_s2 + $0xa48] sm:$0xff] %v2959_v9  ;;  %v2963_v11 = vld [vmem:[%s6414_s1 + $0x258] sm:$0xff]  ;;  %v2965_v12 = vld [vmem:[%s6414_s1 + $0x260] sm:$0xff] }
  0xa7   :  { %2962 = vst [vmem:[%s6413_s2 + $0xa50] sm:$0xff] %v2961_v10  ;;  %2964 = vst [vmem:[%s6413_s2 + $0xa58] sm:$0xff] %v2963_v11  ;;  %v2967_v13 = vld [vmem:[%s6414_s1 + $0x268] sm:$0xff]  ;;  %v2969_v14 = vld [vmem:[%s6414_s1 + $0x270] sm:$0xff] }
  0xa8   :  { %2966 = vst [vmem:[%s6413_s2 + $0xa60] sm:$0xff] %v2965_v12  ;;  %v2971_v15 = vld [vmem:[%s6414_s1 + $0x278] sm:$0xff]  ;;  %2968 = vst [vmem:[%s6413_s2 + $0xa68] sm:$0xff] %v2967_v13  ;;  %v2973_v16 = vld [vmem:[%s6414_s1 + $0x280] sm:$0xff] }
  0xa9   :  { %2970 = vst [vmem:[%s6413_s2 + $0xa70] sm:$0xff] %v2969_v14  ;;  %2972 = vst [vmem:[%s6413_s2 + $0xa78] sm:$0xff] %v2971_v15  ;;  %v2975_v17 = vld [vmem:[%s6414_s1 + $0x288] sm:$0xff]  ;;  %v2977_v18 = vld [vmem:[%s6414_s1 + $0x290] sm:$0xff] }
  0xaa   :  { %2974 = vst [vmem:[%s6413_s2 + $0xa80] sm:$0xff] %v2973_v16  ;;  %2976 = vst [vmem:[%s6413_s2 + $0xa88] sm:$0xff] %v2975_v17  ;;  %v2979_v19 = vld [vmem:[%s6414_s1 + $0x298] sm:$0xff]  ;;  %v2981_v20 = vld [vmem:[%s6414_s1 + $0x2a0] sm:$0xff] }
  0xab   :  { %2978 = vst [vmem:[%s6413_s2 + $0xa90] sm:$0xff] %v2977_v18  ;;  %v2983_v21 = vld [vmem:[%s6414_s1 + $0x2a8] sm:$0xff]  ;;  %2980 = vst [vmem:[%s6413_s2 + $0xa98] sm:$0xff] %v2979_v19  ;;  %v2985_v22 = vld [vmem:[%s6414_s1 + $0x2b0] sm:$0xff] }
  0xac   :  { %2982 = vst [vmem:[%s6413_s2 + $0xaa0] sm:$0xff] %v2981_v20  ;;  %2984 = vst [vmem:[%s6413_s2 + $0xaa8] sm:$0xff] %v2983_v21  ;;  %v2987_v23 = vld [vmem:[%s6414_s1 + $0x2b8] sm:$0xff]  ;;  %v2989_v24 = vld [vmem:[%s6414_s1 + $0x2c0] sm:$0xff] }
  0xad   :  { %2986 = vst [vmem:[%s6413_s2 + $0xab0] sm:$0xff] %v2985_v22  ;;  %2988 = vst [vmem:[%s6413_s2 + $0xab8] sm:$0xff] %v2987_v23  ;;  %v2991_v25 = vld [vmem:[%s6414_s1 + $0x2c8] sm:$0xff]  ;;  %v2993_v26 = vld [vmem:[%s6414_s1 + $0x2d0] sm:$0xff] }
  0xae   :  { %2990 = vst [vmem:[%s6413_s2 + $0xac0] sm:$0xff] %v2989_v24  ;;  %v2995_v27 = vld [vmem:[%s6414_s1 + $0x2d8] sm:$0xff]  ;;  %2992 = vst [vmem:[%s6413_s2 + $0xac8] sm:$0xff] %v2991_v25  ;;  %v2997_v28 = vld [vmem:[%s6414_s1 + $0x2e0] sm:$0xff] }
  0xaf   :  { %2994 = vst [vmem:[%s6413_s2 + $0xad0] sm:$0xff] %v2993_v26  ;;  %2996 = vst [vmem:[%s6413_s2 + $0xad8] sm:$0xff] %v2995_v27  ;;  %v2999_v29 = vld [vmem:[%s6414_s1 + $0x2e8] sm:$0xff]  ;;  %v3001_v30 = vld [vmem:[%s6414_s1 + $0x2f0] sm:$0xff] }
  0xb0   :  { %2998 = vst [vmem:[%s6413_s2 + $0xae0] sm:$0xff] %v2997_v28  ;;  %3000 = vst [vmem:[%s6413_s2 + $0xae8] sm:$0xff] %v2999_v29  ;;  %v3003_v31 = vld [vmem:[%s6414_s1 + $0x2f8] sm:$0xff]  ;;  %v3005_v32 = vld [vmem:[%s6414_s1 + $0x300] sm:$0xff] }
  0xb1   :  { %3002 = vst [vmem:[%s6413_s2 + $0xaf0] sm:$0xff] %v3001_v30  ;;  %v3007_v33 = vld [vmem:[%s6414_s1 + $0x308] sm:$0xff]  ;;  %3004 = vst [vmem:[%s6413_s2 + $0xaf8] sm:$0xff] %v3003_v31  ;;  %v3009_v34 = vld [vmem:[%s6414_s1 + $0x310] sm:$0xff] }
  0xb2   :  { %3006 = vst [vmem:[%s6413_s2 + $0xb00] sm:$0xff] %v3005_v32  ;;  %3008 = vst [vmem:[%s6413_s2 + $0xb08] sm:$0xff] %v3007_v33  ;;  %v3011_v35 = vld [vmem:[%s6414_s1 + $0x318] sm:$0xff]  ;;  %v3013_v36 = vld [vmem:[%s6414_s1 + $0x320] sm:$0xff] }
  0xb3   :  { %3010 = vst [vmem:[%s6413_s2 + $0xb10] sm:$0xff] %v3009_v34  ;;  %3012 = vst [vmem:[%s6413_s2 + $0xb18] sm:$0xff] %v3011_v35  ;;  %v3015_v37 = vld [vmem:[%s6414_s1 + $0x328] sm:$0xff]  ;;  %v3017_v38 = vld [vmem:[%s6414_s1 + $0x330] sm:$0xff] }
  0xb4   :  { %3014 = vst [vmem:[%s6413_s2 + $0xb20] sm:$0xff] %v3013_v36  ;;  %v3019_v39 = vld [vmem:[%s6414_s1 + $0x338] sm:$0xff]  ;;  %3016 = vst [vmem:[%s6413_s2 + $0xb28] sm:$0xff] %v3015_v37  ;;  %v3021_v40 = vld [vmem:[%s6414_s1 + $0x340] sm:$0xff] }
  0xb5   :  { %3018 = vst [vmem:[%s6413_s2 + $0xb30] sm:$0xff] %v3017_v38  ;;  %3020 = vst [vmem:[%s6413_s2 + $0xb38] sm:$0xff] %v3019_v39  ;;  %v3023_v41 = vld [vmem:[%s6414_s1 + $0x348] sm:$0xff]  ;;  %v3025_v42 = vld [vmem:[%s6414_s1 + $0x350] sm:$0xff] }
  0xb6   :  { %3022 = vst [vmem:[%s6413_s2 + $0xb40] sm:$0xff] %v3021_v40  ;;  %3024 = vst [vmem:[%s6413_s2 + $0xb48] sm:$0xff] %v3023_v41  ;;  %v3027_v43 = vld [vmem:[%s6414_s1 + $0x358] sm:$0xff]  ;;  %v3029_v44 = vld [vmem:[%s6414_s1 + $0x360] sm:$0xff] }
  0xb7   :  { %3026 = vst [vmem:[%s6413_s2 + $0xb50] sm:$0xff] %v3025_v42  ;;  %v3031_v45 = vld [vmem:[%s6414_s1 + $0x368] sm:$0xff]  ;;  %3028 = vst [vmem:[%s6413_s2 + $0xb58] sm:$0xff] %v3027_v43  ;;  %v3033_v46 = vld [vmem:[%s6414_s1 + $0x370] sm:$0xff] }
  0xb8   :  { %3030 = vst [vmem:[%s6413_s2 + $0xb60] sm:$0xff] %v3029_v44  ;;  %3032 = vst [vmem:[%s6413_s2 + $0xb68] sm:$0xff] %v3031_v45  ;;  %v3035_v47 = vld [vmem:[%s6414_s1 + $0x378] sm:$0xff]  ;;  %v3037_v48 = vld [vmem:[%s6414_s1 + $0x380] sm:$0xff] }
  0xb9   :  { %3034 = vst [vmem:[%s6413_s2 + $0xb70] sm:$0xff] %v3033_v46  ;;  %3036 = vst [vmem:[%s6413_s2 + $0xb78] sm:$0xff] %v3035_v47  ;;  %v3039_v49 = vld [vmem:[%s6414_s1 + $0x388] sm:$0xff]  ;;  %v3041_v50 = vld [vmem:[%s6414_s1 + $0x390] sm:$0xff] }
  0xba   :  { %3038 = vst [vmem:[%s6413_s2 + $0xb80] sm:$0xff] %v3037_v48  ;;  %v3043_v51 = vld [vmem:[%s6414_s1 + $0x398] sm:$0xff]  ;;  %3040 = vst [vmem:[%s6413_s2 + $0xb88] sm:$0xff] %v3039_v49  ;;  %v3045_v52 = vld [vmem:[%s6414_s1 + $0x3a0] sm:$0xff] }
  0xbb   :  { %3042 = vst [vmem:[%s6413_s2 + $0xb90] sm:$0xff] %v3041_v50  ;;  %3044 = vst [vmem:[%s6413_s2 + $0xb98] sm:$0xff] %v3043_v51  ;;  %v3047_v53 = vld [vmem:[%s6414_s1 + $0x3a8] sm:$0xff]  ;;  %v3049_v54 = vld [vmem:[%s6414_s1 + $0x3b0] sm:$0xff] }
  0xbc   :  { %3046 = vst [vmem:[%s6413_s2 + $0xba0] sm:$0xff] %v3045_v52  ;;  %3048 = vst [vmem:[%s6413_s2 + $0xba8] sm:$0xff] %v3047_v53  ;;  %v3051_v55 = vld [vmem:[%s6414_s1 + $0x3b8] sm:$0xff]  ;;  %v3053_v56 = vld [vmem:[%s6414_s1 + $0x3c0] sm:$0xff] }
  0xbd   :  { %3050 = vst [vmem:[%s6413_s2 + $0xbb0] sm:$0xff] %v3049_v54  ;;  %v3055_v57 = vld [vmem:[%s6414_s1 + $0x3c8] sm:$0xff]  ;;  %3052 = vst [vmem:[%s6413_s2 + $0xbb8] sm:$0xff] %v3051_v55  ;;  %v3057_v58 = vld [vmem:[%s6414_s1 + $0x3d0] sm:$0xff] }
  0xbe   :  { %3054 = vst [vmem:[%s6413_s2 + $0xbc0] sm:$0xff] %v3053_v56  ;;  %3056 = vst [vmem:[%s6413_s2 + $0xbc8] sm:$0xff] %v3055_v57  ;;  %v3059_v59 = vld [vmem:[%s6414_s1 + $0x3d8] sm:$0xff]  ;;  %v3061_v60 = vld [vmem:[%s6414_s1 + $0x3e0] sm:$0xff] }
  0xbf   :  { %3058 = vst [vmem:[%s6413_s2 + $0xbd0] sm:$0xff] %v3057_v58  ;;  %3060 = vst [vmem:[%s6413_s2 + $0xbd8] sm:$0xff] %v3059_v59  ;;  %v3063_v61 = vld [vmem:[%s6414_s1 + $0x3e8] sm:$0xff]  ;;  %v3065_v62 = vld [vmem:[%s6414_s1 + $0x3f0] sm:$0xff] }
  0xc0   :  { %3062 = vst [vmem:[%s6413_s2 + $0xbe0] sm:$0xff] %v3061_v60  ;;  %v3067_v63 = vld [vmem:[%s6414_s1 + $0x3f8] sm:$0xff]  ;;  %3064 = vst [vmem:[%s6413_s2 + $0xbe8] sm:$0xff] %v3063_v61  ;;  %v3069_v0 = vld [vmem:[%s6414_s1 + $0x400] sm:$0xff] }
  0xc1   :  { %3066 = vst [vmem:[%s6413_s2 + $0xbf0] sm:$0xff] %v3065_v62  ;;  %3068 = vst [vmem:[%s6413_s2 + $0xbf8] sm:$0xff] %v3067_v63  ;;  %v3071_v1 = vld [vmem:[%s6414_s1 + $0x408] sm:$0xff]  ;;  %v3073_v2 = vld [vmem:[%s6414_s1 + $0x410] sm:$0xff] }
  0xc2   :  { %3070 = vst [vmem:[%s6413_s2 + $0xc00] sm:$0xff] %v3069_v0  ;;  %3072 = vst [vmem:[%s6413_s2 + $0xc08] sm:$0xff] %v3071_v1  ;;  %v3075_v3 = vld [vmem:[%s6414_s1 + $0x418] sm:$0xff]  ;;  %v3077_v4 = vld [vmem:[%s6414_s1 + $0x420] sm:$0xff] }
  0xc3   :  { %3074 = vst [vmem:[%s6413_s2 + $0xc10] sm:$0xff] %v3073_v2  ;;  %v3079_v5 = vld [vmem:[%s6414_s1 + $0x428] sm:$0xff]  ;;  %3076 = vst [vmem:[%s6413_s2 + $0xc18] sm:$0xff] %v3075_v3  ;;  %v3081_v6 = vld [vmem:[%s6414_s1 + $0x430] sm:$0xff] }
  0xc4   :  { %3078 = vst [vmem:[%s6413_s2 + $0xc20] sm:$0xff] %v3077_v4  ;;  %3080 = vst [vmem:[%s6413_s2 + $0xc28] sm:$0xff] %v3079_v5  ;;  %v3083_v7 = vld [vmem:[%s6414_s1 + $0x438] sm:$0xff]  ;;  %v3085_v8 = vld [vmem:[%s6414_s1 + $0x440] sm:$0xff] }
  0xc5   :  { %3082 = vst [vmem:[%s6413_s2 + $0xc30] sm:$0xff] %v3081_v6  ;;  %3084 = vst [vmem:[%s6413_s2 + $0xc38] sm:$0xff] %v3083_v7  ;;  %v3087_v9 = vld [vmem:[%s6414_s1 + $0x448] sm:$0xff]  ;;  %v3089_v10 = vld [vmem:[%s6414_s1 + $0x450] sm:$0xff] }
  0xc6   :  { %3086 = vst [vmem:[%s6413_s2 + $0xc40] sm:$0xff] %v3085_v8  ;;  %v3091_v11 = vld [vmem:[%s6414_s1 + $0x458] sm:$0xff]  ;;  %3088 = vst [vmem:[%s6413_s2 + $0xc48] sm:$0xff] %v3087_v9  ;;  %v3093_v12 = vld [vmem:[%s6414_s1 + $0x460] sm:$0xff] }
  0xc7   :  { %3090 = vst [vmem:[%s6413_s2 + $0xc50] sm:$0xff] %v3089_v10  ;;  %3092 = vst [vmem:[%s6413_s2 + $0xc58] sm:$0xff] %v3091_v11  ;;  %v3095_v13 = vld [vmem:[%s6414_s1 + $0x468] sm:$0xff]  ;;  %v3097_v14 = vld [vmem:[%s6414_s1 + $0x470] sm:$0xff] }
  0xc8   :  { %3094 = vst [vmem:[%s6413_s2 + $0xc60] sm:$0xff] %v3093_v12  ;;  %3096 = vst [vmem:[%s6413_s2 + $0xc68] sm:$0xff] %v3095_v13  ;;  %v3099_v15 = vld [vmem:[%s6414_s1 + $0x478] sm:$0xff]  ;;  %v3101_v16 = vld [vmem:[%s6414_s1 + $0x480] sm:$0xff] }
  0xc9   :  { %3098 = vst [vmem:[%s6413_s2 + $0xc70] sm:$0xff] %v3097_v14  ;;  %v3103_v17 = vld [vmem:[%s6414_s1 + $0x488] sm:$0xff]  ;;  %3100 = vst [vmem:[%s6413_s2 + $0xc78] sm:$0xff] %v3099_v15  ;;  %v3105_v18 = vld [vmem:[%s6414_s1 + $0x490] sm:$0xff] }
  0xca   :  { %3102 = vst [vmem:[%s6413_s2 + $0xc80] sm:$0xff] %v3101_v16  ;;  %3104 = vst [vmem:[%s6413_s2 + $0xc88] sm:$0xff] %v3103_v17  ;;  %v3107_v19 = vld [vmem:[%s6414_s1 + $0x498] sm:$0xff]  ;;  %v3109_v20 = vld [vmem:[%s6414_s1 + $0x4a0] sm:$0xff] }
  0xcb   :  { %3106 = vst [vmem:[%s6413_s2 + $0xc90] sm:$0xff] %v3105_v18  ;;  %3108 = vst [vmem:[%s6413_s2 + $0xc98] sm:$0xff] %v3107_v19  ;;  %v3111_v21 = vld [vmem:[%s6414_s1 + $0x4a8] sm:$0xff]  ;;  %v3113_v22 = vld [vmem:[%s6414_s1 + $0x4b0] sm:$0xff] }
  0xcc   :  { %3110 = vst [vmem:[%s6413_s2 + $0xca0] sm:$0xff] %v3109_v20  ;;  %v3115_v23 = vld [vmem:[%s6414_s1 + $0x4b8] sm:$0xff]  ;;  %3112 = vst [vmem:[%s6413_s2 + $0xca8] sm:$0xff] %v3111_v21  ;;  %v3117_v24 = vld [vmem:[%s6414_s1 + $0x4c0] sm:$0xff] }
  0xcd   :  { %3114 = vst [vmem:[%s6413_s2 + $0xcb0] sm:$0xff] %v3113_v22  ;;  %3116 = vst [vmem:[%s6413_s2 + $0xcb8] sm:$0xff] %v3115_v23  ;;  %v3119_v25 = vld [vmem:[%s6414_s1 + $0x4c8] sm:$0xff]  ;;  %v3121_v26 = vld [vmem:[%s6414_s1 + $0x4d0] sm:$0xff] }
  0xce   :  { %3118 = vst [vmem:[%s6413_s2 + $0xcc0] sm:$0xff] %v3117_v24  ;;  %3120 = vst [vmem:[%s6413_s2 + $0xcc8] sm:$0xff] %v3119_v25  ;;  %v3123_v27 = vld [vmem:[%s6414_s1 + $0x4d8] sm:$0xff]  ;;  %v3125_v28 = vld [vmem:[%s6414_s1 + $0x4e0] sm:$0xff] }
  0xcf   :  { %3122 = vst [vmem:[%s6413_s2 + $0xcd0] sm:$0xff] %v3121_v26  ;;  %v3127_v29 = vld [vmem:[%s6414_s1 + $0x4e8] sm:$0xff]  ;;  %3124 = vst [vmem:[%s6413_s2 + $0xcd8] sm:$0xff] %v3123_v27  ;;  %v3129_v30 = vld [vmem:[%s6414_s1 + $0x4f0] sm:$0xff] }
  0xd0   :  { %3126 = vst [vmem:[%s6413_s2 + $0xce0] sm:$0xff] %v3125_v28  ;;  %3128 = vst [vmem:[%s6413_s2 + $0xce8] sm:$0xff] %v3127_v29  ;;  %v3131_v31 = vld [vmem:[%s6414_s1 + $0x4f8] sm:$0xff]  ;;  %v3133_v32 = vld [vmem:[%s6414_s1 + $0x500] sm:$0xff] }
  0xd1   :  { %3130 = vst [vmem:[%s6413_s2 + $0xcf0] sm:$0xff] %v3129_v30  ;;  %3132 = vst [vmem:[%s6413_s2 + $0xcf8] sm:$0xff] %v3131_v31  ;;  %v3135_v33 = vld [vmem:[%s6414_s1 + $0x508] sm:$0xff]  ;;  %v3137_v34 = vld [vmem:[%s6414_s1 + $0x510] sm:$0xff] }
  0xd2   :  { %3134 = vst [vmem:[%s6413_s2 + $0xd00] sm:$0xff] %v3133_v32  ;;  %v3139_v35 = vld [vmem:[%s6414_s1 + $0x518] sm:$0xff]  ;;  %3136 = vst [vmem:[%s6413_s2 + $0xd08] sm:$0xff] %v3135_v33  ;;  %v3141_v36 = vld [vmem:[%s6414_s1 + $0x520] sm:$0xff] }
  0xd3   :  { %3138 = vst [vmem:[%s6413_s2 + $0xd10] sm:$0xff] %v3137_v34  ;;  %3140 = vst [vmem:[%s6413_s2 + $0xd18] sm:$0xff] %v3139_v35  ;;  %v3143_v37 = vld [vmem:[%s6414_s1 + $0x528] sm:$0xff]  ;;  %v3145_v38 = vld [vmem:[%s6414_s1 + $0x530] sm:$0xff] }
  0xd4   :  { %3142 = vst [vmem:[%s6413_s2 + $0xd20] sm:$0xff] %v3141_v36  ;;  %3144 = vst [vmem:[%s6413_s2 + $0xd28] sm:$0xff] %v3143_v37  ;;  %v3147_v39 = vld [vmem:[%s6414_s1 + $0x538] sm:$0xff]  ;;  %v3149_v40 = vld [vmem:[%s6414_s1 + $0x540] sm:$0xff] }
  0xd5   :  { %3146 = vst [vmem:[%s6413_s2 + $0xd30] sm:$0xff] %v3145_v38  ;;  %v3151_v41 = vld [vmem:[%s6414_s1 + $0x548] sm:$0xff]  ;;  %3148 = vst [vmem:[%s6413_s2 + $0xd38] sm:$0xff] %v3147_v39  ;;  %v3153_v42 = vld [vmem:[%s6414_s1 + $0x550] sm:$0xff] }
  0xd6   :  { %3150 = vst [vmem:[%s6413_s2 + $0xd40] sm:$0xff] %v3149_v40  ;;  %3152 = vst [vmem:[%s6413_s2 + $0xd48] sm:$0xff] %v3151_v41  ;;  %v3155_v43 = vld [vmem:[%s6414_s1 + $0x558] sm:$0xff]  ;;  %v3157_v44 = vld [vmem:[%s6414_s1 + $0x560] sm:$0xff] }
  0xd7   :  { %3154 = vst [vmem:[%s6413_s2 + $0xd50] sm:$0xff] %v3153_v42  ;;  %3156 = vst [vmem:[%s6413_s2 + $0xd58] sm:$0xff] %v3155_v43  ;;  %v3159_v45 = vld [vmem:[%s6414_s1 + $0x568] sm:$0xff]  ;;  %v3161_v46 = vld [vmem:[%s6414_s1 + $0x570] sm:$0xff] }
  0xd8   :  { %3158 = vst [vmem:[%s6413_s2 + $0xd60] sm:$0xff] %v3157_v44  ;;  %v3163_v47 = vld [vmem:[%s6414_s1 + $0x578] sm:$0xff]  ;;  %3160 = vst [vmem:[%s6413_s2 + $0xd68] sm:$0xff] %v3159_v45  ;;  %v3165_v48 = vld [vmem:[%s6414_s1 + $0x580] sm:$0xff] }
  0xd9   :  { %3162 = vst [vmem:[%s6413_s2 + $0xd70] sm:$0xff] %v3161_v46  ;;  %3164 = vst [vmem:[%s6413_s2 + $0xd78] sm:$0xff] %v3163_v47  ;;  %v3167_v49 = vld [vmem:[%s6414_s1 + $0x588] sm:$0xff]  ;;  %v3169_v50 = vld [vmem:[%s6414_s1 + $0x590] sm:$0xff] }
  0xda   :  { %3166 = vst [vmem:[%s6413_s2 + $0xd80] sm:$0xff] %v3165_v48  ;;  %3168 = vst [vmem:[%s6413_s2 + $0xd88] sm:$0xff] %v3167_v49  ;;  %v3171_v51 = vld [vmem:[%s6414_s1 + $0x598] sm:$0xff]  ;;  %v3173_v52 = vld [vmem:[%s6414_s1 + $0x5a0] sm:$0xff] }
  0xdb   :  { %3170 = vst [vmem:[%s6413_s2 + $0xd90] sm:$0xff] %v3169_v50  ;;  %v3175_v53 = vld [vmem:[%s6414_s1 + $0x5a8] sm:$0xff]  ;;  %3172 = vst [vmem:[%s6413_s2 + $0xd98] sm:$0xff] %v3171_v51  ;;  %v3177_v54 = vld [vmem:[%s6414_s1 + $0x5b0] sm:$0xff] }
  0xdc   :  { %3174 = vst [vmem:[%s6413_s2 + $0xda0] sm:$0xff] %v3173_v52  ;;  %3176 = vst [vmem:[%s6413_s2 + $0xda8] sm:$0xff] %v3175_v53  ;;  %v3179_v55 = vld [vmem:[%s6414_s1 + $0x5b8] sm:$0xff]  ;;  %v3181_v56 = vld [vmem:[%s6414_s1 + $0x5c0] sm:$0xff] }
  0xdd   :  { %3178 = vst [vmem:[%s6413_s2 + $0xdb0] sm:$0xff] %v3177_v54  ;;  %3180 = vst [vmem:[%s6413_s2 + $0xdb8] sm:$0xff] %v3179_v55  ;;  %v3183_v57 = vld [vmem:[%s6414_s1 + $0x5c8] sm:$0xff]  ;;  %v3185_v58 = vld [vmem:[%s6414_s1 + $0x5d0] sm:$0xff] }
  0xde   :  { %3182 = vst [vmem:[%s6413_s2 + $0xdc0] sm:$0xff] %v3181_v56  ;;  %v3187_v59 = vld [vmem:[%s6414_s1 + $0x5d8] sm:$0xff]  ;;  %3184 = vst [vmem:[%s6413_s2 + $0xdc8] sm:$0xff] %v3183_v57  ;;  %v3189_v60 = vld [vmem:[%s6414_s1 + $0x5e0] sm:$0xff] }
  0xdf   :  { %3186 = vst [vmem:[%s6413_s2 + $0xdd0] sm:$0xff] %v3185_v58  ;;  %3188 = vst [vmem:[%s6413_s2 + $0xdd8] sm:$0xff] %v3187_v59  ;;  %v3191_v61 = vld [vmem:[%s6414_s1 + $0x5e8] sm:$0xff]  ;;  %v3193_v62 = vld [vmem:[%s6414_s1 + $0x5f0] sm:$0xff] }
  0xe0   :  { %3190 = vst [vmem:[%s6413_s2 + $0xde0] sm:$0xff] %v3189_v60  ;;  %3192 = vst [vmem:[%s6413_s2 + $0xde8] sm:$0xff] %v3191_v61  ;;  %v3195_v63 = vld [vmem:[%s6414_s1 + $0x5f8] sm:$0xff]  ;;  %v3197_v0 = vld [vmem:[%s6414_s1 + $0x600] sm:$0xff] }
  0xe1   :  { %3194 = vst [vmem:[%s6413_s2 + $0xdf0] sm:$0xff] %v3193_v62  ;;  %v3199_v1 = vld [vmem:[%s6414_s1 + $0x608] sm:$0xff]  ;;  %3196 = vst [vmem:[%s6413_s2 + $0xdf8] sm:$0xff] %v3195_v63  ;;  %v3201_v2 = vld [vmem:[%s6414_s1 + $0x610] sm:$0xff] }
  0xe2   :  { %3198 = vst [vmem:[%s6413_s2 + $0xe00] sm:$0xff] %v3197_v0  ;;  %3200 = vst [vmem:[%s6413_s2 + $0xe08] sm:$0xff] %v3199_v1  ;;  %v3203_v3 = vld [vmem:[%s6414_s1 + $0x618] sm:$0xff]  ;;  %v3205_v4 = vld [vmem:[%s6414_s1 + $0x620] sm:$0xff] }
  0xe3   :  { %3202 = vst [vmem:[%s6413_s2 + $0xe10] sm:$0xff] %v3201_v2  ;;  %3204 = vst [vmem:[%s6413_s2 + $0xe18] sm:$0xff] %v3203_v3  ;;  %v3207_v5 = vld [vmem:[%s6414_s1 + $0x628] sm:$0xff]  ;;  %v3209_v6 = vld [vmem:[%s6414_s1 + $0x630] sm:$0xff] }
  0xe4   :  { %3206 = vst [vmem:[%s6413_s2 + $0xe20] sm:$0xff] %v3205_v4  ;;  %v3211_v7 = vld [vmem:[%s6414_s1 + $0x638] sm:$0xff]  ;;  %3208 = vst [vmem:[%s6413_s2 + $0xe28] sm:$0xff] %v3207_v5  ;;  %v3213_v8 = vld [vmem:[%s6414_s1 + $0x640] sm:$0xff] }
  0xe5   :  { %3210 = vst [vmem:[%s6413_s2 + $0xe30] sm:$0xff] %v3209_v6  ;;  %3212 = vst [vmem:[%s6413_s2 + $0xe38] sm:$0xff] %v3211_v7  ;;  %v3215_v9 = vld [vmem:[%s6414_s1 + $0x648] sm:$0xff]  ;;  %v3217_v10 = vld [vmem:[%s6414_s1 + $0x650] sm:$0xff] }
  0xe6   :  { %3214 = vst [vmem:[%s6413_s2 + $0xe40] sm:$0xff] %v3213_v8  ;;  %3216 = vst [vmem:[%s6413_s2 + $0xe48] sm:$0xff] %v3215_v9  ;;  %v3219_v11 = vld [vmem:[%s6414_s1 + $0x658] sm:$0xff]  ;;  %v3221_v12 = vld [vmem:[%s6414_s1 + $0x660] sm:$0xff] }
  0xe7   :  { %3218 = vst [vmem:[%s6413_s2 + $0xe50] sm:$0xff] %v3217_v10  ;;  %v3223_v13 = vld [vmem:[%s6414_s1 + $0x668] sm:$0xff]  ;;  %3220 = vst [vmem:[%s6413_s2 + $0xe58] sm:$0xff] %v3219_v11  ;;  %v3225_v14 = vld [vmem:[%s6414_s1 + $0x670] sm:$0xff] }
  0xe8   :  { %3222 = vst [vmem:[%s6413_s2 + $0xe60] sm:$0xff] %v3221_v12  ;;  %3224 = vst [vmem:[%s6413_s2 + $0xe68] sm:$0xff] %v3223_v13  ;;  %v3227_v15 = vld [vmem:[%s6414_s1 + $0x678] sm:$0xff]  ;;  %v3229_v16 = vld [vmem:[%s6414_s1 + $0x680] sm:$0xff] }
  0xe9   :  { %3226 = vst [vmem:[%s6413_s2 + $0xe70] sm:$0xff] %v3225_v14  ;;  %3228 = vst [vmem:[%s6413_s2 + $0xe78] sm:$0xff] %v3227_v15  ;;  %v3231_v17 = vld [vmem:[%s6414_s1 + $0x688] sm:$0xff]  ;;  %v3233_v18 = vld [vmem:[%s6414_s1 + $0x690] sm:$0xff] }
  0xea   :  { %3230 = vst [vmem:[%s6413_s2 + $0xe80] sm:$0xff] %v3229_v16  ;;  %v3235_v19 = vld [vmem:[%s6414_s1 + $0x698] sm:$0xff]  ;;  %3232 = vst [vmem:[%s6413_s2 + $0xe88] sm:$0xff] %v3231_v17  ;;  %v3237_v20 = vld [vmem:[%s6414_s1 + $0x6a0] sm:$0xff] }
  0xeb   :  { %3234 = vst [vmem:[%s6413_s2 + $0xe90] sm:$0xff] %v3233_v18  ;;  %3236 = vst [vmem:[%s6413_s2 + $0xe98] sm:$0xff] %v3235_v19  ;;  %v3239_v21 = vld [vmem:[%s6414_s1 + $0x6a8] sm:$0xff]  ;;  %v3241_v22 = vld [vmem:[%s6414_s1 + $0x6b0] sm:$0xff] }
  0xec   :  { %3238 = vst [vmem:[%s6413_s2 + $0xea0] sm:$0xff] %v3237_v20  ;;  %3240 = vst [vmem:[%s6413_s2 + $0xea8] sm:$0xff] %v3239_v21  ;;  %v3243_v23 = vld [vmem:[%s6414_s1 + $0x6b8] sm:$0xff]  ;;  %v3245_v24 = vld [vmem:[%s6414_s1 + $0x6c0] sm:$0xff] }
  0xed   :  { %3242 = vst [vmem:[%s6413_s2 + $0xeb0] sm:$0xff] %v3241_v22  ;;  %v3247_v25 = vld [vmem:[%s6414_s1 + $0x6c8] sm:$0xff]  ;;  %3244 = vst [vmem:[%s6413_s2 + $0xeb8] sm:$0xff] %v3243_v23  ;;  %v3249_v26 = vld [vmem:[%s6414_s1 + $0x6d0] sm:$0xff] }
  0xee   :  { %3246 = vst [vmem:[%s6413_s2 + $0xec0] sm:$0xff] %v3245_v24  ;;  %3248 = vst [vmem:[%s6413_s2 + $0xec8] sm:$0xff] %v3247_v25  ;;  %v3251_v27 = vld [vmem:[%s6414_s1 + $0x6d8] sm:$0xff]  ;;  %v3253_v28 = vld [vmem:[%s6414_s1 + $0x6e0] sm:$0xff] }
  0xef   :  { %3250 = vst [vmem:[%s6413_s2 + $0xed0] sm:$0xff] %v3249_v26  ;;  %3252 = vst [vmem:[%s6413_s2 + $0xed8] sm:$0xff] %v3251_v27  ;;  %v3255_v29 = vld [vmem:[%s6414_s1 + $0x6e8] sm:$0xff]  ;;  %v3257_v30 = vld [vmem:[%s6414_s1 + $0x6f0] sm:$0xff] }
  0xf0   :  { %3254 = vst [vmem:[%s6413_s2 + $0xee0] sm:$0xff] %v3253_v28  ;;  %v3259_v31 = vld [vmem:[%s6414_s1 + $0x6f8] sm:$0xff]  ;;  %3256 = vst [vmem:[%s6413_s2 + $0xee8] sm:$0xff] %v3255_v29  ;;  %v3261_v32 = vld [vmem:[%s6414_s1 + $0x700] sm:$0xff] }
  0xf1   :  { %3258 = vst [vmem:[%s6413_s2 + $0xef0] sm:$0xff] %v3257_v30  ;;  %3260 = vst [vmem:[%s6413_s2 + $0xef8] sm:$0xff] %v3259_v31  ;;  %v3263_v33 = vld [vmem:[%s6414_s1 + $0x708] sm:$0xff]  ;;  %v3265_v34 = vld [vmem:[%s6414_s1 + $0x710] sm:$0xff] }
  0xf2   :  { %3262 = vst [vmem:[%s6413_s2 + $0xf00] sm:$0xff] %v3261_v32  ;;  %3264 = vst [vmem:[%s6413_s2 + $0xf08] sm:$0xff] %v3263_v33  ;;  %v3267_v35 = vld [vmem:[%s6414_s1 + $0x718] sm:$0xff]  ;;  %v3269_v36 = vld [vmem:[%s6414_s1 + $0x720] sm:$0xff] }
  0xf3   :  { %3266 = vst [vmem:[%s6413_s2 + $0xf10] sm:$0xff] %v3265_v34  ;;  %v3271_v37 = vld [vmem:[%s6414_s1 + $0x728] sm:$0xff]  ;;  %3268 = vst [vmem:[%s6413_s2 + $0xf18] sm:$0xff] %v3267_v35  ;;  %v3273_v38 = vld [vmem:[%s6414_s1 + $0x730] sm:$0xff] }
  0xf4   :  { %3270 = vst [vmem:[%s6413_s2 + $0xf20] sm:$0xff] %v3269_v36  ;;  %3272 = vst [vmem:[%s6413_s2 + $0xf28] sm:$0xff] %v3271_v37  ;;  %v3275_v39 = vld [vmem:[%s6414_s1 + $0x738] sm:$0xff]  ;;  %v3277_v40 = vld [vmem:[%s6414_s1 + $0x740] sm:$0xff] }
  0xf5   :  { %3274 = vst [vmem:[%s6413_s2 + $0xf30] sm:$0xff] %v3273_v38  ;;  %3276 = vst [vmem:[%s6413_s2 + $0xf38] sm:$0xff] %v3275_v39  ;;  %v3279_v41 = vld [vmem:[%s6414_s1 + $0x748] sm:$0xff]  ;;  %v3281_v42 = vld [vmem:[%s6414_s1 + $0x750] sm:$0xff] }
  0xf6   :  { %3278 = vst [vmem:[%s6413_s2 + $0xf40] sm:$0xff] %v3277_v40  ;;  %v3283_v43 = vld [vmem:[%s6414_s1 + $0x758] sm:$0xff]  ;;  %3280 = vst [vmem:[%s6413_s2 + $0xf48] sm:$0xff] %v3279_v41  ;;  %v3285_v44 = vld [vmem:[%s6414_s1 + $0x760] sm:$0xff] }
  0xf7   :  { %3282 = vst [vmem:[%s6413_s2 + $0xf50] sm:$0xff] %v3281_v42  ;;  %3284 = vst [vmem:[%s6413_s2 + $0xf58] sm:$0xff] %v3283_v43  ;;  %v3287_v45 = vld [vmem:[%s6414_s1 + $0x768] sm:$0xff]  ;;  %v3289_v46 = vld [vmem:[%s6414_s1 + $0x770] sm:$0xff] }
  0xf8   :  { %3286 = vst [vmem:[%s6413_s2 + $0xf60] sm:$0xff] %v3285_v44  ;;  %3288 = vst [vmem:[%s6413_s2 + $0xf68] sm:$0xff] %v3287_v45  ;;  %v3291_v47 = vld [vmem:[%s6414_s1 + $0x778] sm:$0xff]  ;;  %v3293_v48 = vld [vmem:[%s6414_s1 + $0x780] sm:$0xff] }
  0xf9   :  { %3290 = vst [vmem:[%s6413_s2 + $0xf70] sm:$0xff] %v3289_v46  ;;  %v3295_v49 = vld [vmem:[%s6414_s1 + $0x788] sm:$0xff]  ;;  %3292 = vst [vmem:[%s6413_s2 + $0xf78] sm:$0xff] %v3291_v47  ;;  %v3297_v50 = vld [vmem:[%s6414_s1 + $0x790] sm:$0xff] }
  0xfa   :  { %3294 = vst [vmem:[%s6413_s2 + $0xf80] sm:$0xff] %v3293_v48  ;;  %3296 = vst [vmem:[%s6413_s2 + $0xf88] sm:$0xff] %v3295_v49  ;;  %v3299_v51 = vld [vmem:[%s6414_s1 + $0x798] sm:$0xff]  ;;  %v3301_v52 = vld [vmem:[%s6414_s1 + $0x7a0] sm:$0xff] }
  0xfb   :  { %3298 = vst [vmem:[%s6413_s2 + $0xf90] sm:$0xff] %v3297_v50  ;;  %3300 = vst [vmem:[%s6413_s2 + $0xf98] sm:$0xff] %v3299_v51  ;;  %v3303_v53 = vld [vmem:[%s6414_s1 + $0x7a8] sm:$0xff]  ;;  %v3305_v54 = vld [vmem:[%s6414_s1 + $0x7b0] sm:$0xff] }
  0xfc   :  { %3302 = vst [vmem:[%s6413_s2 + $0xfa0] sm:$0xff] %v3301_v52  ;;  %v3307_v55 = vld [vmem:[%s6414_s1 + $0x7b8] sm:$0xff]  ;;  %3304 = vst [vmem:[%s6413_s2 + $0xfa8] sm:$0xff] %v3303_v53  ;;  %v3309_v56 = vld [vmem:[%s6414_s1 + $0x7c0] sm:$0xff] }
  0xfd   :  { %3306 = vst [vmem:[%s6413_s2 + $0xfb0] sm:$0xff] %v3305_v54  ;;  %3308 = vst [vmem:[%s6413_s2 + $0xfb8] sm:$0xff] %v3307_v55  ;;  %v3311_v57 = vld [vmem:[%s6414_s1 + $0x7c8] sm:$0xff]  ;;  %v3313_v58 = vld [vmem:[%s6414_s1 + $0x7d0] sm:$0xff] }
  0xfe   :  { %3310 = vst [vmem:[%s6413_s2 + $0xfc0] sm:$0xff] %v3309_v56  ;;  %3312 = vst [vmem:[%s6413_s2 + $0xfc8] sm:$0xff] %v3311_v57  ;;  %v3315_v59 = vld [vmem:[%s6414_s1 + $0x7d8] sm:$0xff]  ;;  %v3317_v60 = vld [vmem:[%s6414_s1 + $0x7e0] sm:$0xff] }
  0xff   :  { %3314 = vst [vmem:[%s6413_s2 + $0xfd0] sm:$0xff] %v3313_v58  ;;  %v3319_v61 = vld [vmem:[%s6414_s1 + $0x7e8] sm:$0xff]  ;;  %3316 = vst [vmem:[%s6413_s2 + $0xfd8] sm:$0xff] %v3315_v59  ;;  %v3321_v62 = vld [vmem:[%s6414_s1 + $0x7f0] sm:$0xff] }
 0x100   :  { %3318 = vst [vmem:[%s6413_s2 + $0xfe0] sm:$0xff] %v3317_v60  ;;  %3320 = vst [vmem:[%s6413_s2 + $0xfe8] sm:$0xff] %v3319_v61  ;;  %v3323_v63 = vld [vmem:[%s6414_s1 + $0x7f8] sm:$0xff] }
 0x101   :  { %3322 = vst [vmem:[%s6413_s2 + $0xff0] sm:$0xff] %v3321_v62  ;;  %3324 = vst [vmem:[%s6413_s2 + $0xff8] sm:$0xff] %v3323_v63 }

// kernel: complex_conv_transpose2d.1
= control target key start
LH: loop header
LB: loop body
LE: loop exit
PB: predicated region body
PF: predicated region fallthrough
CT: control target
= control target key end

     0   :  { %s1430_s12 = smov 0   ;;  %s1675_s0 = inlined_call_operand.vmem [shape: f32[2,8,456], index: 0, kind: input, shape index: {}]   ;;  %s1676_s1 = inlined_call_operand.vmem [shape: f32[8,128], index: 1, kind: input, shape index: {}]   ;;  %s1677_s2 = inlined_call_operand.vmem [shape: f32[8,1], index: 2, kind: input, shape index: {}]   ;;  %s1678_s3 = inlined_call_operand.vmem [shape: f32[2,4,8,384], index: 3, kind: output, shape index: {}]  }
   0x1 LB: > { %s1271_s13 = sadd.s32 4294967295, %s1394_s12   ;;  %p1275_p0 = scmp.ge.s32.totalorder %s1394_s12, 1  ;;  %s1394_s12 = sphi %s1430_s12, %s13_s12  }
   0x2   : > { %p137_p1 = scmp.lt.s32.totalorder %s1394_s12, 3 }
   0x4   : > { %p138_p2 = pnand %p1275_p0, %p137_p1 }
   0x5   : > { %p161_p3 = scmp.lt.s32.totalorder (!%p138_p2), %s1271_s13, 1  ;;  %s1397_s18 = smov (!%p138_p2), 127  }
   0x6   : > { %141 = sbr.rel (%p138_p2) target bundleno = 452 (0x1c4), region = 32  ;;  %s1398_s19 = smov (!%p138_p2), 104  }
   0x7   : > { %s1399_s20 = smov (!%p138_p2), 103   ;;  %s1401_s21 = smov (!%p138_p2), 126  }
   0x8   : > { %s1402_s22 = smov (!%p138_p2), 102   ;;  %s1403_s25 = smov (!%p138_p2), 96  }
   0x9   : > { %s1404_s26 = smov (!%p138_p2), 80   ;;  %s1405_s27 = smov (!%p138_p2), 79  }
   0xa   : > { %s1406_s28 = smov (!%p138_p2), 64   ;;  %s1407_s29 = smov (!%p138_p2), 78  }
   0xb   : > { %s1680_s13 = smov (!%p161_p3, %s1271_s13), 1  ;;  %v1396_v0 = vmov 0.0   ;;  %vm1400_vm0 = vmmov 0   ;;  %v1519_v5 = vld [vmem:[%s1676_s1] sm:$0xff]  ;;  %v1408_v6 = vmov 0   ;;  %vm245_vm1 = vcmask 1039360  }
   0xc   : > { %s1298_s14 = sshll.u32 %s1680_s13, 5  ;;  %1319 = vmatprep.subr.mxu1 %v1396_v0  ;;  %342 = vmatprep.mubr.f32.mxu0 %v1396_v0  ;;  %vm219_vm2 = vcmask 850944   ;;  %v171_v15 = vld [vmem:[%s1677_s2] sm:$0xff]  ;;  %s1409_s5 = smov 32   ;;  %vm193_vm3 = vcmask 842752   ;;  %vm274_vm4 = vcmask 261120  }
   0xd   : > { %s165_s17 = scalar_lea.vmem %s1675_s0, %s1298_s14  ;;  %1327 = vmatprep.mubr.msk.f32.mxu1 %vm1400_vm0, %v1396_v0  ;;  %1386 = vset.pattern.permute.xlu1 %v1408_v6  ;;  %vm489_vm5 = vcmask 1031168   ;;  %vm438_vm6 = vcmask 834560   ;;  %vm729_vm7 = vcmask 654336   ;;  %vm703_vm8 = vcmask 646144   ;;  %s1363_s6 = smul.u32 96, %s1680_s13 }
   0xe   : > { %v1446_v1 = vld [vmem:[%s165_s17 + $0x8] sm:$0xff]  ;;  %v1448_v2 = vld [vmem:[%s165_s17] sm:$0xff]  ;;  %v1454_v3 = vld [vmem:[%s165_s17 + $0x10] sm:$0xff]  ;;  %1387 = vset.pattern.permute.xlu0 %v1408_v6  ;;  %vm968_vm9 = vcmask 637952  }
   0xf   : > { %239 = vrot.lane.b32.xlu0 %v1446_v1, %s1397_s18  ;;  %237 = vrot.lane.b32.xlu1 %v1448_v2, %s1397_s18  ;;  %v1468_v4 = vld [vmem:[%s165_s17 + $0x18] sm:$0xff]  ;;  %s1658_s9 = scalar_lea.vmem %s1678_s3, %s1363_s6 }
  0x10   : > { %302 = vmatprep.subr.mxu0 %v1446_v1  ;;  %1320 = vmatpush3.msra.mxu1 %v1454_v3 }
  0x11   : > { %303 = vmatpush1.msra.mxu0 %v1448_v2  ;;  %1321 = vmatprep.subr.mxu1 %v1396_v0 }
  0x13   : > { %241 = vrot.lane.b32.xlu0 %v1454_v3, %s1397_s18  ;;  %213 = vrot.lane.b32.xlu1 %v1446_v1, %s1398_s19 }
  0x17   : > { %215 = vrot.lane.b32.xlu0 %v1454_v3, %s1398_s19  ;;  %211 = vrot.lane.b32.xlu1 %v1448_v2, %s1398_s19 }
  0x1b   : > { %243 = vrot.lane.b32.xlu0 %v1468_v4, %s1397_s18  ;;  %187 = vrot.lane.b32.xlu1 %v1446_v1, %s1399_s20 }
  0x1f   : > { %189 = vrot.lane.b32.xlu0 %v1454_v3, %s1399_s20  ;;  %185 = vrot.lane.b32.xlu1 %v1448_v2, %s1399_s20 }
  0x23   : > { %217 = vrot.lane.b32.xlu0 %v1468_v4, %s1398_s19  ;;  %509 = vrot.lane.b32.xlu1 %v1446_v1, %s1397_s18 }
  0x27   : > { %511 = vrot.lane.b32.xlu0 %v1454_v3, %s1397_s18  ;;  %191 = vrot.lane.b32.xlu1 %v1468_v4, %s1399_s20 }
  0x2b   : > { %507 = vrot.lane.b32.xlu0 %v1448_v2, %s1397_s18  ;;  %483 = vrot.lane.b32.xlu1 %v1446_v1, %s1401_s21 }
  0x2f   : > { %485 = vrot.lane.b32.xlu0 %v1454_v3, %s1401_s21  ;;  %481 = vrot.lane.b32.xlu1 %v1448_v2, %s1401_s21 }
  0x33   : > { %513 = vrot.lane.b32.xlu0 %v1468_v4, %s1397_s18  ;;  %458 = vrot.lane.b32.xlu1 %v1446_v1, %s1399_s20 }
  0x37   : > { %460 = vrot.lane.b32.xlu0 %v1454_v3, %s1399_s20  ;;  %456 = vrot.lane.b32.xlu1 %v1448_v2, %s1399_s20 }
  0x3b   : > { %487 = vrot.lane.b32.xlu0 %v1468_v4, %s1401_s21  ;;  %432 = vrot.lane.b32.xlu1 %v1446_v1, %s1402_s22 }
  0x3f   : > { %434 = vrot.lane.b32.xlu0 %v1454_v3, %s1402_s22  ;;  %430 = vrot.lane.b32.xlu1 %v1448_v2, %s1402_s22 }
  0x43   : > { %462 = vrot.lane.b32.xlu0 %v1468_v4, %s1399_s20  ;;  %774 = vrot.lane.b32.xlu1 %v1446_v1, %s1398_s19 }
  0x47   : > { %776 = vrot.lane.b32.xlu0 %v1454_v3, %s1398_s19  ;;  %436 = vrot.lane.b32.xlu1 %v1468_v4, %s1402_s22 }
  0x4b   : > { %772 = vrot.lane.b32.xlu0 %v1448_v2, %s1398_s19  ;;  %538 = vrot.lane.b32.xlu1 %v1519_v5, %s1403_s25 }
  0x4f   : > { %749 = vrot.lane.b32.xlu0 %v1446_v1, %s1399_s20  ;;  %751 = vrot.lane.b32.xlu1 %v1454_v3, %s1399_s20 }
  0x53   : > { %747 = vrot.lane.b32.xlu0 %v1448_v2, %s1399_s20  ;;  %778 = vrot.lane.b32.xlu1 %v1468_v4, %s1398_s19 }
  0x57   : > { %723 = vrot.lane.b32.xlu0 %v1446_v1, %s1404_s26  ;;  %725 = vrot.lane.b32.xlu1 %v1454_v3, %s1404_s26 }
  0x5b   : > { %721 = vrot.lane.b32.xlu0 %v1448_v2, %s1404_s26  ;;  %753 = vrot.lane.b32.xlu1 %v1468_v4, %s1399_s20 }
  0x5f   : > { %697 = vrot.lane.b32.xlu0 %v1446_v1, %s1405_s27  ;;  %699 = vrot.lane.b32.xlu1 %v1454_v3, %s1405_s27 }
  0x63   : > { %695 = vrot.lane.b32.xlu0 %v1448_v2, %s1405_s27  ;;  %727 = vrot.lane.b32.xlu1 %v1468_v4, %s1404_s26 }
  0x67   : > { %1038 = vrot.lane.b32.xlu0 %v1446_v1, %s1399_s20  ;;  %1040 = vrot.lane.b32.xlu1 %v1454_v3, %s1399_s20 }
  0x6b   : > { %701 = vrot.lane.b32.xlu0 %v1468_v4, %s1405_s27  ;;  %1036 = vrot.lane.b32.xlu1 %v1448_v2, %s1399_s20 }
  0x6f   : > { %803 = vrot.lane.b32.xlu0 %v1519_v5, %s1406_s28  ;;  %1013 = vrot.lane.b32.xlu1 %v1446_v1, %s1402_s22 }
  0x73   : > { %1015 = vrot.lane.b32.xlu0 %v1454_v3, %s1402_s22  ;;  %1011 = vrot.lane.b32.xlu1 %v1448_v2, %s1402_s22 }
  0x77   : > { %1042 = vrot.lane.b32.xlu0 %v1468_v4, %s1399_s20  ;;  %988 = vrot.lane.b32.xlu1 %v1446_v1, %s1405_s27 }
  0x7b   : > { %990 = vrot.lane.b32.xlu0 %v1454_v3, %s1405_s27  ;;  %986 = vrot.lane.b32.xlu1 %v1448_v2, %s1405_s27 }
  0x7f   : > { %1017 = vrot.lane.b32.xlu0 %v1468_v4, %s1402_s22  ;;  %962 = vrot.lane.b32.xlu1 %v1446_v1, %s1407_s29 }
  0x81   : > { %v240_v7 = vpop.permute.xlu0 %239  ;;  %v238_v8 = vpop.permute.xlu1 %237 }
  0x82   : > { %v246_v12 = vsel %vm245_vm1, %v238_v8, %v240_v7 }
  0x83   : > { %964 = vrot.lane.b32.xlu0 %v1454_v3, %s1407_s29  ;;  %960 = vrot.lane.b32.xlu1 %v1448_v2, %s1407_s29 }
  0x85   : > { %v242_v9 = vpop.permute.xlu0 %241  ;;  %v214_v10 = vpop.permute.xlu1 %213 }
  0x86   : > { %v247_v11 = vsel %vm245_vm1, %v240_v7, %v242_v9 }
  0x87   : > { %304 = vmatprep.subr.mxu0 %v247_v11  ;;  %992 = vrot.lane.b32.xlu0 %v1468_v4, %s1405_s27 }
  0x88   : > { %966 = vrot.lane.b32.xlu1 %v1468_v4, %s1407_s29  ;;  %305 = vmatpush1.msra.mxu0 %v246_v12 }
  0x89   : > { %v216_v13 = vpop.permute.xlu0 %215  ;;  %v212_v14 = vpop.permute.xlu1 %211 }
  0x8a   : > { %v221_v16 = vsel %vm219_vm2, %v214_v10, %v216_v13  ;;  %v220_v17 = vsel %vm219_vm2, %v212_v14, %v214_v10 }
  0x8b   : > { %306 = vmatprep.subr.mxu0 %v221_v16  ;;  %1067 = vrot.lane.b32.xlu0 %v1519_v5, %s1409_s5 }
  0x8c   : > { %307 = vmatpush1.msra.mxu0 %v220_v17  ;;  %174 = vperm.xlu1 %1386, %v171_v15  }
  0x8d   : > { %v244_v18 = vpop.permute.xlu0 %243  ;;  %v188_v19 = vpop.permute.xlu1 %187 }
  0x8e   : > { %v248_v20 = vsel %vm245_vm1, %v242_v9, %v244_v18 }
  0x8f   : > { %1322 = vmatpush3.msra.mxu1 %v248_v20 }
  0x90   : > { %1323 = vmatprep.subr.mxu1 %v1396_v0 }
  0x91   : > { %v190_v21 = vpop.permute.xlu0 %189  ;;  %v186_v22 = vpop.permute.xlu1 %185 }
  0x92   : > { %v195_v23 = vsel %vm193_vm3, %v188_v19, %v190_v21  ;;  %v194_v24 = vsel %vm193_vm3, %v186_v22, %v188_v19 }
  0x93   : > { %308 = vmatprep.subr.mxu0 %v195_v23 }
  0x94   : > { %309 = vmatpush1.msra.mxu0 %v194_v24 }
  0x95   : > { %v218_v25 = vpop.permute.xlu0 %217  ;;  %v510_v26 = vpop.permute.xlu1 %509  ;;  %1279 = vmatmul.mubr.msk.f32.vlgmr.msra.gmra.mxu0 %vm274_vm4, %v1519_v5 }
  0x96   : > { %v222_v27 = vsel %vm219_vm2, %v216_v13, %v218_v25  ;;  %606 = vmatprep.mubr.f32.mxu0 %v1396_v0 }
  0x97   : > { %1324 = vmatpush3.msra.mxu1 %v222_v27 }
  0x98   : > { %1325 = vmatprep.subr.mxu1 %v1396_v0 }
  0x99   : > { %v512_v28 = vpop.permute.xlu0 %511  ;;  %v192_v29 = vpop.permute.xlu1 %191 }
  0x9a   : > { %v196_v30 = vsel %vm193_vm3, %v190_v21, %v192_v29  ;;  %v516_v31 = vsel %vm245_vm1, %v510_v26, %v512_v28 }
  0x9b   : > { %1326 = vmatpush3.msra.mxu1 %v196_v30  ;;  %566 = vmatprep.subr.mxu0 %v516_v31 }
  0x9c   : > { %1330 = vmatprep.subr.mxu1 %v1396_v0  ;;  %1328 = vmatmul.mubr.msk.f32.vlgmr.msra.gmra.mxu1 %vm274_vm4, %v1519_v5 }
  0x9d   : > { %v508_v32 = vpop.permute.xlu0 %507  ;;  %v484_v33 = vpop.permute.xlu1 %483  ;;  %1338 = vmatprep.mubr.msk.f32.mxu1 %vm1400_vm0, %v1396_v0 }
  0x9e   : > { %v515_v34 = vsel %vm245_vm1, %v508_v32, %v510_v26 }
  0x9f   : > { %567 = vmatpush1.msra.mxu0 %v515_v34 }
  0xa1   : > { %v486_v35 = vpop.permute.xlu0 %485  ;;  %v482_v36 = vpop.permute.xlu1 %481 }
  0xa2   : > { %v490_v37 = vsel %vm489_vm5, %v482_v36, %v484_v33  ;;  %v491_v38 = vsel %vm489_vm5, %v484_v33, %v486_v35 }
  0xa3   : > { %568 = vmatprep.subr.mxu0 %v491_v38 }
  0xa4   : > { %569 = vmatpush1.msra.mxu0 %v490_v37 }
  0xa5   : > { %v514_v39 = vpop.permute.xlu0 %513  ;;  %v459_v40 = vpop.permute.xlu1 %458 }
  0xa6   : > { %v517_v41 = vsel %vm245_vm1, %v512_v28, %v514_v39 }
  0xa7   : > { %1331 = vmatpush3.msra.mxu1 %v517_v41 }
  0xa8   : > { %1332 = vmatprep.subr.mxu1 %v1396_v0 }
  0xa9   : > { %v461_v42 = vpop.permute.xlu0 %460  ;;  %v457_v43 = vpop.permute.xlu1 %456 }
  0xaa   : > { %v464_v44 = vsel %vm193_vm3, %v457_v43, %v459_v40  ;;  %v465_v45 = vsel %vm193_vm3, %v459_v40, %v461_v42 }
  0xab   : > { %570 = vmatprep.subr.mxu0 %v465_v45 }
  0xac   : > { %571 = vmatpush1.msra.mxu0 %v464_v44 }
  0xad   : > { %v488_v46 = vpop.permute.xlu0 %487  ;;  %v433_v47 = vpop.permute.xlu1 %432 }
  0xae   : > { %v492_v48 = vsel %vm489_vm5, %v486_v35, %v488_v46 }
  0xaf   : > { %1333 = vmatpush3.msra.mxu1 %v492_v48 }
  0xb0   : > { %1334 = vmatprep.subr.mxu1 %v1396_v0 }
  0xb1   : > { %v435_v49 = vpop.permute.xlu0 %434  ;;  %v431_v50 = vpop.permute.xlu1 %430 }
  0xb2   : > { %v439_v51 = vsel %vm438_vm6, %v431_v50, %v433_v47  ;;  %v440_v52 = vsel %vm438_vm6, %v433_v47, %v435_v49 }
  0xb3   : > { %572 = vmatprep.subr.mxu0 %v440_v52 }
  0xb4   : > { %573 = vmatpush1.msra.mxu0 %v439_v51 }
  0xb5   : > { %v463_v53 = vpop.permute.xlu0 %462  ;;  %v775_v54 = vpop.permute.xlu1 %774 }
  0xb6   : > { %v466_v55 = vsel %vm193_vm3, %v461_v42, %v463_v53 }
  0xb7   : > { %1335 = vmatpush3.msra.mxu1 %v466_v55 }
  0xb8   : > { %1336 = vmatprep.subr.mxu1 %v1396_v0 }
  0xb9   : > { %v777_v56 = vpop.permute.xlu0 %776  ;;  %v437_v57 = vpop.permute.xlu1 %436 }
  0xba   : > { %v441_v58 = vsel %vm438_vm6, %v435_v49, %v437_v57  ;;  %v781_v59 = vsel %vm219_vm2, %v775_v54, %v777_v56 }
  0xbb   : > { %1337 = vmatpush3.msra.mxu1 %v441_v58  ;;  %831 = vmatprep.subr.mxu0 %v781_v59 }
  0xbc   : > { %1341 = vmatprep.subr.mxu1 %v1396_v0 }
  0xbd   : > { %v773_v60 = vpop.permute.xlu0 %772  ;;  %v539_v61 = vpop.permute.xlu1 %538 }
  0xbe   : > { %v780_v62 = vsel %vm219_vm2, %v773_v60, %v775_v54  ;;  %1281 = vmatmul.mubr.msk.f32.vlgmr.msra.gmra.mxu0 %vm274_vm4, %v539_v61  ;;  %1339 = vmatmul.mubr.msk.f32.vlgmr.msra.gmra.mxu1 %vm274_vm4, %v539_v61 }
  0xbf   : > { %832 = vmatpush1.msra.mxu0 %v780_v62  ;;  %871 = vmatprep.mubr.f32.mxu0 %v1396_v0 }
  0xc0   : > { %1349 = vmatprep.mubr.msk.f32.mxu1 %vm1400_vm0, %v1396_v0 }
  0xc1   : > { %v750_v63 = vpop.permute.xlu0 %749  ;;  %v752_v1 = vpop.permute.xlu1 %751 }
  0xc2   : > { %v756_v2 = vsel %vm193_vm3, %v750_v63, %v752_v1 }
  0xc3   : > { %833 = vmatprep.subr.mxu0 %v756_v2 }
  0xc5   : > { %v748_v3 = vpop.permute.xlu0 %747  ;;  %v779_v4 = vpop.permute.xlu1 %778 }
  0xc6   : > { %v755_v5 = vsel %vm193_vm3, %v748_v3, %v750_v63  ;;  %v782_v6 = vsel %vm219_vm2, %v777_v56, %v779_v4 }
  0xc7   : > { %834 = vmatpush1.msra.mxu0 %v755_v5  ;;  %1342 = vmatpush3.msra.mxu1 %v782_v6 }
  0xc8   : > { %1343 = vmatprep.subr.mxu1 %v1396_v0 }
  0xc9   : > { %v724_v7 = vpop.permute.xlu0 %723  ;;  %v726_v8 = vpop.permute.xlu1 %725 }
  0xca   : > { %v731_v9 = vsel %vm729_vm7, %v724_v7, %v726_v8 }
  0xcb   : > { %835 = vmatprep.subr.mxu0 %v731_v9 }
  0xcd   : > { %v722_v10 = vpop.permute.xlu0 %721  ;;  %v754_v11 = vpop.permute.xlu1 %753 }
  0xce   : > { %v730_v12 = vsel %vm729_vm7, %v722_v10, %v724_v7  ;;  %v757_v13 = vsel %vm193_vm3, %v752_v1, %v754_v11 }
  0xcf   : > { %836 = vmatpush1.msra.mxu0 %v730_v12  ;;  %1344 = vmatpush3.msra.mxu1 %v757_v13 }
  0xd0   : > { %1345 = vmatprep.subr.mxu1 %v1396_v0 }
  0xd1   : > { %v698_v14 = vpop.permute.xlu0 %697  ;;  %v700_v15 = vpop.permute.xlu1 %699 }
  0xd2   : > { %v705_v16 = vsel %vm703_vm8, %v698_v14, %v700_v15 }
  0xd3   : > { %837 = vmatprep.subr.mxu0 %v705_v16 }
  0xd5   : > { %v696_v17 = vpop.permute.xlu0 %695  ;;  %v728_v18 = vpop.permute.xlu1 %727 }
  0xd6   : > { %v704_v19 = vsel %vm703_vm8, %v696_v17, %v698_v14  ;;  %v732_v20 = vsel %vm729_vm7, %v726_v8, %v728_v18 }
  0xd7   : > { %838 = vmatpush1.msra.mxu0 %v704_v19  ;;  %1346 = vmatpush3.msra.mxu1 %v732_v20 }
  0xd8   : > { %1347 = vmatprep.subr.mxu1 %v1396_v0 }
  0xd9   : > { %v1039_v21 = vpop.permute.xlu0 %1038  ;;  %v1041_v22 = vpop.permute.xlu1 %1040 }
  0xda   : > { %v1045_v23 = vsel %vm193_vm3, %v1039_v21, %v1041_v22 }
  0xdb   : > { %1095 = vmatprep.subr.mxu0 %v1045_v23 }
  0xdd   : > { %v702_v24 = vpop.permute.xlu0 %701  ;;  %v1037_v25 = vpop.permute.xlu1 %1036 }
  0xde   : > { %v706_v26 = vsel %vm703_vm8, %v700_v15, %v702_v24  ;;  %v1044_v29 = vsel %vm193_vm3, %v1037_v25, %v1039_v21 }
  0xdf   : > { %1348 = vmatpush3.msra.mxu1 %v706_v26 }
  0xe0   : > { %1352 = vmatprep.subr.mxu1 %v1396_v0 }
  0xe1   : > { %v804_v27 = vpop.permute.xlu0 %803  ;;  %v1014_v28 = vpop.permute.xlu1 %1013 }
  0xe2   : > { %1286 = vmatmul.mubr.msk.f32.vlgmr.msra.gmra.mxu0 %vm274_vm4, %v804_v27  ;;  %1350 = vmatmul.mubr.msk.f32.vlgmr.msra.gmra.mxu1 %vm274_vm4, %v804_v27 }
  0xe3   : > { %1096 = vmatpush1.msra.mxu0 %v1044_v29  ;;  %1135 = vmatprep.mubr.f32.mxu0 %v1396_v0 }
  0xe4   : > { %1360 = vmatprep.mubr.msk.f32.mxu1 %vm1400_vm0, %v1396_v0 }
  0xe5   : > { %v1016_v30 = vpop.permute.xlu0 %1015  ;;  %v1012_v31 = vpop.permute.xlu1 %1011 }
  0xe6   : > { %v1019_v32 = vsel %vm438_vm6, %v1012_v31, %v1014_v28  ;;  %v1020_v33 = vsel %vm438_vm6, %v1014_v28, %v1016_v30 }
  0xe7   : > { %1097 = vmatprep.subr.mxu0 %v1020_v33 }
  0xe8   : > { %1098 = vmatpush1.msra.mxu0 %v1019_v32 }
  0xe9   : > { %v1043_v34 = vpop.permute.xlu0 %1042  ;;  %v989_v35 = vpop.permute.xlu1 %988 }
  0xea   : > { %v1046_v36 = vsel %vm193_vm3, %v1041_v22, %v1043_v34 }
  0xeb   : > { %1353 = vmatpush3.msra.mxu1 %v1046_v36 }
  0xec   : > { %1354 = vmatprep.subr.mxu1 %v1396_v0 }
  0xed   : > { %v991_v37 = vpop.permute.xlu0 %990  ;;  %v987_v38 = vpop.permute.xlu1 %986 }
  0xee   : > { %v994_v39 = vsel %vm703_vm8, %v987_v38, %v989_v35  ;;  %v995_v40 = vsel %vm703_vm8, %v989_v35, %v991_v37 }
  0xef   : > { %1099 = vmatprep.subr.mxu0 %v995_v40 }
  0xf0   : > { %1100 = vmatpush1.msra.mxu0 %v994_v39 }
  0xf1   : > { %v1018_v41 = vpop.permute.xlu0 %1017  ;;  %v963_v42 = vpop.permute.xlu1 %962 }
  0xf2   : > { %v1021_v43 = vsel %vm438_vm6, %v1016_v30, %v1018_v41 }
  0xf3   : > { %1355 = vmatpush3.msra.mxu1 %v1021_v43 }
  0xf4   : > { %1356 = vmatprep.subr.mxu1 %v1396_v0 }
  0xf5   : > { %v965_v44 = vpop.permute.xlu0 %964  ;;  %v961_v45 = vpop.permute.xlu1 %960 }
  0xf6   : > { %v969_v46 = vsel %vm968_vm9, %v961_v45, %v963_v42  ;;  %v970_v47 = vsel %vm968_vm9, %v963_v42, %v965_v44 }
  0xf7   : > { %1101 = vmatprep.subr.mxu0 %v970_v47 }
  0xf8   : > { %1102 = vmatpush1.msra.mxu0 %v969_v46 }
  0xf9   : > { %v993_v48 = vpop.permute.xlu0 %992 }
  0xfa   : > { %v996_v49 = vsel %vm703_vm8, %v991_v37, %v993_v48  ;;  %v967_v50 = vpop.permute.xlu1 %966 }
  0xfb   : > { %1357 = vmatpush3.msra.mxu1 %v996_v49  ;;  %v971_v51 = vsel %vm968_vm9, %v965_v44, %v967_v50 }
  0xfc   : > { %1358 = vmatprep.subr.mxu1 %v1396_v0 }
  0xfd   : > { %v1068_v52 = vpop.permute.xlu0 %1067  ;;  %1359 = vmatpush3.msra.mxu1 %v971_v51 }
  0xfe   : > { %1291 = vmatmul.mubr.msk.f32.vlgmr.msra.gmra.mxu0 %vm274_vm4, %v1068_v52  ;;  %1361 = vmatmul.mubr.msk.f32.vlgmr.msra.gmra.mxu1 %vm274_vm4, %v1068_v52 }
 0x107   : > { %v175_v54 = vpop.permute.xlu1 %174 }
 0x155   : > { %v344_v53 = vpop.f32.mrf.mxu0 }
 0x156   : > { %v345_v55 = vadd.f32 %v344_v53, %v175_v54 }
 0x157   : > { %v346_v56 = vpop.f32.mrf.mxu0 }
 0x158   : > { %v347_v0 = vadd.f32 %v346_v56, %v175_v54  ;;  %419 = vst [vmem:[%s1658_s9] sm:$0xff] %v345_v55 }
 0x15a   : > { %420 = vst [vmem:[%s1658_s9 + $0x8] sm:$0xff] %v347_v0 }
 0x15c   : > { %v415_v57 = vpop.f32.mrf.mxu1 }
 0x15d   : > { %v416_v58 = vadd.f32 %v415_v57, %v175_v54 }
 0x15e   : > { %v1329_v59 = vpop.f32.mrf.mxu1 }
 0x15f   : > { %421 = vst [vmem:[%s1658_s9 + $0x10] sm:$0xff] %v416_v58 }
 0x17e   : > { %v608_v60 = vpop.f32.mrf.mxu0  ;;  %v679_v61 = vpop.f32.mrf.mxu1 }
 0x17f   : > { %v609_v62 = vadd.f32 %v608_v60, %v175_v54  ;;  %v680_v63 = vadd.f32 %v679_v61, %v175_v54 }
 0x180   : > { %v610_v1 = vpop.f32.mrf.mxu0  ;;  %v1340_v2 = vpop.f32.mrf.mxu1 }
 0x181   : > { %v611_v3 = vadd.f32 %v610_v1, %v175_v54  ;;  %1283 = vst [vmem:[%s1658_s9 + $0x18] sm:$0xff] %v609_v62  ;;  %1285 = vst [vmem:[%s1658_s9 + $0x28] sm:$0xff] %v680_v63 }
 0x183   : > { %1284 = vst [vmem:[%s1658_s9 + $0x20] sm:$0xff] %v611_v3 }
 0x1a2   : > { %v873_v4 = vpop.f32.mrf.mxu0  ;;  %v944_v5 = vpop.f32.mrf.mxu1 }
 0x1a3   : > { %v874_v6 = vadd.f32 %v873_v4, %v175_v54  ;;  %v945_v7 = vadd.f32 %v944_v5, %v175_v54 }
 0x1a4   : > { %v875_v8 = vpop.f32.mrf.mxu0  ;;  %v1351_v9 = vpop.f32.mrf.mxu1 }
 0x1a5   : > { %1288 = vst [vmem:[%s1658_s9 + $0x30] sm:$0xff] %v874_v6  ;;  %1290 = vst [vmem:[%s1658_s9 + $0x40] sm:$0xff] %v945_v7  ;;  %v876_v10 = vadd.f32 %v875_v8, %v175_v54 }
 0x1a7   : > { %1289 = vst [vmem:[%s1658_s9 + $0x38] sm:$0xff] %v876_v10 }
 0x1be   : > { %v1137_v11 = vpop.f32.mrf.mxu0  ;;  %v1208_v12 = vpop.f32.mrf.mxu1 }
 0x1bf   : > { %v1138_v13 = vadd.f32 %v1137_v11, %v175_v54  ;;  %v1209_v14 = vadd.f32 %v1208_v12, %v175_v54 }
 0x1c0   : > { %v1139_v15 = vpop.f32.mrf.mxu0  ;;  %v1362_v16 = vpop.f32.mrf.mxu1 }
 0x1c1   : > { %1293 = vst [vmem:[%s1658_s9 + $0x48] sm:$0xff] %v1138_v13  ;;  %1295 = vst [vmem:[%s1658_s9 + $0x58] sm:$0xff] %v1209_v14  ;;  %v1140_v17 = vadd.f32 %v1139_v15, %v175_v54 }
 0x1c3   : > { %1294 = vst [vmem:[%s1658_s9 + $0x50] sm:$0xff] %v1140_v17 }
 0x1c4 PF: > { %s13_s12 = sadd.s32 1, %s1394_s12  }
 0x1c5   : > { %p10_p4 = scmp.ge.s32.totalorder %s13_s12, 4  }
 0x1c7   :  { %12 = sbr.rel (!%p10_p4) target bundleno = 1 (0x1), region = 65 }

</bundles_post_ra>
